<compile_context>
chip_gen: v6e
topology: v6e:2x2x1
jax: 0.10.0
libtpu: 0.0.40
codegen_flags: <defaults>
</compile_context>

<pallas_src>
import math

import jax
import jax.numpy as jnp
from jax.experimental import pallas as pl
from jax.experimental.pallas import tpu as pltpu


# ----------------------------------------------------------------------------
# Fused kernel: wavefront over L LSTM layers x T timesteps + encoder_proj.
# ----------------------------------------------------------------------------
def _make_fused_kernel(L, N, T, H):
    def kernel(*refs):
        it = iter(refs)
        x_ref = next(it)                                        # (T*N, D) time-major flat
        layer_refs = [(next(it), next(it), next(it)) for _ in range(L)]  # (W_ih^T, W_hh^T, b)
        h0_ref, c0_ref = next(it), next(it)                     # (L, N, H)
        wp_ref, bp_ref = next(it), next(it)                     # (H, Jpad), (1, Jpad)
        out_ref, h_out_ref, c_out_ref = next(it), next(it), next(it)
        y_scr = next(it)                                        # VMEM scratch (T*N, H) f32

        # Load every weight / bias exactly once (hoisted out of all loops).
        wih = [r[0][...] for r in layer_refs]                   # (Din, 4H), bf16 or f32
        whh = [r[1][...] for r in layer_refs]                   # (H, 4H)
        bias = [r[2][...] for r in layer_refs]                  # (1, 4H) f32
        wdt = whh[0].dtype                                      # MXU compute dtype

        # Hoisted input projection for layer 0: one batched MXU matmul over
        # all T*N rows instead of T tiny matmuls on the serial path.
        gx0 = (jnp.dot(x_ref[...].astype(wdt), wih[0],
                       preferred_element_type=jnp.float32)
               + bias[0])                                       # (T*N, 4H) f32

        h_st = [h0_ref[l] for l in range(L)]                    # (N, H) f32
        c_st = [c0_ref[l] for l in range(L)]
        out_prev = [None] * L   # layer-l output at its most recently processed timestep

        def lstm_cell(gates, c_prev):
            # Two full-width EUP passes (sigmoid, tanh); gate order i, f, g, o.
            sig = jax.nn.sigmoid(gates)
            th = jnp.tanh(gates)
            i_g = sig[:, 0 * H:1 * H]
            f_g = sig[:, 1 * H:2 * H]
            g_g = th[:, 2 * H:3 * H]
            o_g = sig[:, 3 * H:4 * H]
            c_new = f_g * c_prev + i_g * g_g
            h_new = o_g * jnp.tanh(c_new)
            return h_new, c_new

        # Wavefront schedule: step s handles (layer l, time t = s - l) for all
        # valid l.  Per-step matmuls of different layers are independent; the
        # dependent chain is T + L - 1 steps instead of T * L.
        # (Statically unrolled: T, L are small and static.  For large streaming
        #  chunks switch the time dimension to lax.fori_loop.)
        for s in range(T + L - 1):
            # Descending layer order so out_prev[l-1] still holds step s-1's value.
            for l in range(min(s, L - 1), -1, -1):
                t = s - l
                if t < 0 or t >= T:
                    continue
                rec = jnp.dot(h_st[l].astype(wdt), whh[l],
                              preferred_element_type=jnp.float32)     # (N, 4H)
                if l == 0:
                    gates = gx0[t * N:(t + 1) * N, :] + rec
                else:
                    gates = (jnp.dot(out_prev[l - 1].astype(wdt), wih[l],
                                     preferred_element_type=jnp.float32)
                             + rec + bias[l])
                h_new, c_new = lstm_cell(gates, c_st[l])
                h_st[l] = h_new
                c_st[l] = c_new
                out_prev[l] = h_new
                if l == L - 1:
                    # Per-step store into VMEM scratch (vst slot, no relayout tree).
                    y_scr[pl.ds(t * N, N), :] = h_new

        # Final states written once per layer (not every timestep).
        for l in range(L):
            h_out_ref[l] = h_st[l]
            c_out_ref[l] = c_st[l]

        # encoder_proj epilogue: one matmul + one lane-dense whole-block store;
        # the y intermediate never touches HBM.
        proj = (jnp.dot(y_scr[...].astype(wdt), wp_ref[...],
                        preferred_element_type=jnp.float32)
                + bp_ref[...])                                   # (T*N, Jpad) f32
        out_ref[...] = proj

    return kernel


# ----------------------------------------------------------------------------
# One-time parameter preparation (hoisted out of the per-call path).
# ----------------------------------------------------------------------------
def prepare_params(params, num_layers, weight_dtype=jnp.bfloat16):
    """Transpose weights, fuse biases, pad the projection to a lane-dense width,
    and cast matmul weights to `weight_dtype` (bf16 by default for the MXU)."""
    prep = {}
    for l in range(num_layers):
        prep[f"wih_t_{l}"] = jnp.transpose(params[f"w_ih_{l}"]).astype(weight_dtype)  # (Din,4H)
        prep[f"whh_t_{l}"] = jnp.transpose(params[f"w_hh_{l}"]).astype(weight_dtype)  # (H,4H)
        prep[f"b_{l}"] = (params[f"b_ih_{l}"]
                          + params[f"b_hh_{l}"]).reshape(1, -1).astype(jnp.float32)   # (1,4H)
    wp_t = jnp.transpose(params["w_proj"]).astype(weight_dtype)                        # (H,J)
    bp = params["b_proj"].reshape(1, -1).astype(jnp.float32)                           # (1,J)
    J = wp_t.shape[1]
    j_pad = ((J + 127) // 128) * 128          # lane-dense output width (multiple of 128)
    if j_pad != J:
        wp_t = jnp.pad(wp_t, ((0, 0), (0, j_pad - J)))
        bp = jnp.pad(bp, ((0, 0), (0, j_pad - J)))
    prep["wp_t"] = wp_t                        # (H, Jpad)
    prep["bp"] = bp                            # (1, Jpad)
    return prep


def _nbytes(a):
    return math.prod(a.shape) * jnp.dtype(a.dtype).itemsize


# ----------------------------------------------------------------------------
# MergedEncoder.forward
# ----------------------------------------------------------------------------
def merged_encoder_forward(prep, x, h, c, *, out_dim):
    """x: (N, T, D) batch-first; h, c: (L, N, H). Returns (proj (N,T,J), h_n, c_n)."""
    N, T, D = x.shape
    L, _, H = h.shape
    Jpad = prep["wp_t"].shape[1]

    # Time-major flattening (row = t*N + n): per-step slices in the kernel are
    # contiguous leading-dim slices.  Tiny transpose, off the serial path.
    x_tm = jnp.transpose(x, (1, 0, 2)).reshape(T * N, D)

    args = [x_tm]
    in_specs = [pl.BlockSpec((T * N, D), lambda i: (0, 0))]
    for l in range(L):
        wih = prep[f"wih_t_{l}"]
        din = wih.shape[0]
        args += [wih, prep[f"whh_t_{l}"], prep[f"b_{l}"]]
        in_specs += [
            pl.BlockSpec((din, 4 * H), lambda i: (0, 0)),
            pl.BlockSpec((H, 4 * H), lambda i: (0, 0)),
            pl.BlockSpec((1, 4 * H), lambda i: (0, 0)),
        ]
    args += [h, c, prep["wp_t"], prep["bp"]]
    in_specs += [
        pl.BlockSpec((L, N, H), lambda i: (0, 0, 0)),
        pl.BlockSpec((L, N, H), lambda i: (0, 0, 0)),
        pl.BlockSpec((H, Jpad), lambda i: (0, 0)),
        pl.BlockSpec((1, Jpad), lambda i: (0, 0)),
    ]

    out_shape = (
        jax.ShapeDtypeStruct((T * N, Jpad), jnp.float32),   # lane-dense projected output
        jax.ShapeDtypeStruct((L, N, H), jnp.float32),
        jax.ShapeDtypeStruct((L, N, H), jnp.float32),
    )
    out_specs = (
        pl.BlockSpec((T * N, Jpad), lambda i: (0, 0)),
        pl.BlockSpec((L, N, H), lambda i: (0, 0, 0)),
        pl.BlockSpec((L, N, H), lambda i: (0, 0, 0)),
    )
    scratch_shapes = [pltpu.VMEM((T * N, H), jnp.float32)]   # last-layer outputs over time

    # Explicit scoped-VMEM budget: block bytes (double-buffered) + scratch + headroom.
    vmem_needed = (sum(2 * _nbytes(a) for a in args)
                   + sum(2 * _nbytes(o) for o in out_shape)
                   + T * N * H * 4)
    vmem_limit = int(min(64 << 20, max(16 << 20, vmem_needed + (4 << 20))))

    out_p, h_n, c_n = pl.pallas_call(
        _make_fused_kernel(L, N, T, H),
        out_shape=out_shape,
        grid_spec=pltpu.PrefetchScalarGridSpec(
            num_scalar_prefetch=0,
            grid=(1,),
            in_specs=in_specs,
            out_specs=out_specs,
            scratch_shapes=scratch_shapes,
        ),
        compiler_params=pltpu.CompilerParams(
            dimension_semantics=("arbitrary",),
            vmem_limit_bytes=vmem_limit,
        ),
    )(*args)

    # Layout plumbing back to (N, T, J) in the wrapper (tiny, off serial path).
    proj = jnp.transpose(out_p.reshape(T, N, Jpad), (1, 0, 2))[:, :, :out_dim]
    return proj, h_n, c_n


# ----------------------------------------------------------------------------
# Pure-JAX reference for verification
# ----------------------------------------------------------------------------
def ref_lstm_layer(x_tm, w_ih, w_hh, b_ih, b_hh, h0, c0):
    b = b_ih + b_hh

    def step(carry, x_t):
        h, c = carry
        gates = x_t @ w_ih.T + h @ w_hh.T + b
        i, f, g, o = jnp.split(gates, 4, axis=-1)
        i = jax.nn.sigmoid(i)
        f = jax.nn.sigmoid(f)
        g = jnp.tanh(g)
        o = jax.nn.sigmoid(o)
        c = f * c + i * g
        h = o * jnp.tanh(c)
        return (h, c), h

    (h_n, c_n), ys = jax.lax.scan(step, (h0, c0), x_tm)
    return ys, h_n, c_n


def ref_forward(params, x, h, c):
    L = h.shape[0]
    cur = jnp.transpose(x, (1, 0, 2))
    new_h, new_c = [], []
    for l in range(L):
        cur, h_n, c_n = ref_lstm_layer(cur,
                                       params[f"w_ih_{l}"], params[f"w_hh_{l}"],
                                       params[f"b_ih_{l}"], params[f"b_hh_{l}"],
                                       h[l], c[l])
        new_h.append(h_n)
        new_c.append(c_n)
    y = jnp.transpose(cur, (1, 0, 2))
    proj = y @ params["w_proj"].T + params["b_proj"]
    return proj, jnp.stack(new_h), jnp.stack(new_c)


# ----------------------------------------------------------------------------
if __name__ == "__main__":
    # Small shapes consistent with the module: batch N=2, seq T=8, input D=32,
    # hidden H=32, layers L=2, joiner projection J=64.
    N, T, D, H, L, J = 2, 8, 32, 32, 2, 64

    key = jax.random.PRNGKey(0)
    keys = jax.random.split(key, 4 * L + 5)
    k = 1.0 / jnp.sqrt(jnp.float32(H))

    params = {}
    ki = 0
    for l in range(L):
        d_in = D if l == 0 else H
        params[f"w_ih_{l}"] = jax.random.uniform(keys[ki], (4 * H, d_in),
                                                 jnp.float32, -k, k); ki += 1
        params[f"w_hh_{l}"] = jax.random.uniform(keys[ki], (4 * H, H),
                                                 jnp.float32, -k, k); ki += 1
        params[f"b_ih_{l}"] = jax.random.uniform(keys[ki], (4 * H,),
                                                 jnp.float32, -k, k); ki += 1
        params[f"b_hh_{l}"] = jax.random.uniform(keys[ki], (4 * H,),
                                                 jnp.float32, -k, k); ki += 1
    params["w_proj"] = jax.random.uniform(keys[ki], (J, H),
                                          jnp.float32, -k, k); ki += 1
    params["b_proj"] = jax.random.uniform(keys[ki], (J,),
                                          jnp.float32, -k, k); ki += 1

    x = jax.random.normal(keys[ki], (N, T, D), jnp.float32); ki += 1
    h = jax.random.normal(keys[ki], (L, N, H), jnp.float32); ki += 1
    c = jax.random.normal(keys[ki], (L, N, H), jnp.float32); ki += 1

    ref_out, ref_h, ref_c = ref_forward(params, x, h, c)

    fwd = jax.jit(merged_encoder_forward, static_argnames=("out_dim",))

    # 1) f32-weight path: exact algorithmic check against the reference.
    prep_f32 = prepare_params(params, L, weight_dtype=jnp.float32)
    out32, h32, c32 = jax.block_until_ready(fwd(prep_f32, x, h, c, out_dim=J))
    assert jnp.allclose(out32, ref_out, rtol=1e-4, atol=1e-4)
    assert jnp.allclose(h32, ref_h, rtol=1e-4, atol=1e-4)
    assert jnp.allclose(c32, ref_c, rtol=1e-4, atol=1e-4)

    # 2) bf16-weight fast path (MXU-native): tolerance reflects bf16 weight
    #    rounding accumulated over the recurrence, not a kernel bug.
    prep_bf16 = prepare_params(params, L, weight_dtype=jnp.bfloat16)
    out16, h16, c16 = jax.block_until_ready(fwd(prep_bf16, x, h, c, out_dim=J))
    assert jnp.allclose(out16, ref_out, rtol=0.0, atol=1e-1)
    assert jnp.allclose(h16, ref_h, rtol=0.0, atol=1e-1)
    assert jnp.allclose(c16, ref_c, rtol=0.0, atol=1e-1)

    print("KERNEL_OK")
</pallas_src>

<mosaic_0001>
module attributes {stable_mosaic.version = 11 : i64} {
  func.func @kernel(%arg0: i32, %arg1: memref<16x32xf32, #tpu.memory_space<vmem>>, %arg2: memref<32x128xf32, #tpu.memory_space<vmem>>, %arg3: memref<32x128xf32, #tpu.memory_space<vmem>>, %arg4: memref<1x128xf32, #tpu.memory_space<vmem>>, %arg5: memref<32x128xf32, #tpu.memory_space<vmem>>, %arg6: memref<32x128xf32, #tpu.memory_space<vmem>>, %arg7: memref<1x128xf32, #tpu.memory_space<vmem>>, %arg8: memref<2x2x32xf32, #tpu.memory_space<vmem>>, %arg9: memref<2x2x32xf32, #tpu.memory_space<vmem>>, %arg10: memref<32x128xf32, #tpu.memory_space<vmem>>, %arg11: memref<1x128xf32, #tpu.memory_space<vmem>>, %arg12: memref<16x128xf32, #tpu.memory_space<vmem>>, %arg13: memref<2x2x32xf32, #tpu.memory_space<vmem>>, %arg14: memref<2x2x32xf32, #tpu.memory_space<vmem>>, %arg15: memref<16x32xf32, #tpu.memory_space<vmem>>) attributes {dimension_semantics = [#tpu.dimension_semantics<arbitrary>], iteration_bounds = array<i64: 1>, scalar_prefetch = 0 : i64, scratch_operands = 1 : i64, tpu.core_type = #tpu.core_type<tc>, window_params = [{pipeline_mode = #tpu.pipeline_mode<synchronous>, transform_indices = @transform_0, window_bounds = array<i64: 16, 32>}, {pipeline_mode = #tpu.pipeline_mode<synchronous>, transform_indices = @transform_1, window_bounds = array<i64: 32, 128>}, {pipeline_mode = #tpu.pipeline_mode<synchronous>, transform_indices = @transform_2, window_bounds = array<i64: 32, 128>}, {pipeline_mode = #tpu.pipeline_mode<synchronous>, transform_indices = @transform_3, window_bounds = array<i64: 1, 128>}, {pipeline_mode = #tpu.pipeline_mode<synchronous>, transform_indices = @transform_4, window_bounds = array<i64: 32, 128>}, {pipeline_mode = #tpu.pipeline_mode<synchronous>, transform_indices = @transform_5, window_bounds = array<i64: 32, 128>}, {pipeline_mode = #tpu.pipeline_mode<synchronous>, transform_indices = @transform_6, window_bounds = array<i64: 1, 128>}, {pipeline_mode = #tpu.pipeline_mode<synchronous>, transform_indices = @transform_7, window_bounds = array<i64: 2, 2, 32>}, {pipeline_mode = #tpu.pipeline_mode<synchronous>, transform_indices = @transform_8, window_bounds = array<i64: 2, 2, 32>}, {pipeline_mode = #tpu.pipeline_mode<synchronous>, transform_indices = @transform_9, window_bounds = array<i64: 32, 128>}, {pipeline_mode = #tpu.pipeline_mode<synchronous>, transform_indices = @transform_10, window_bounds = array<i64: 1, 128>}, {pipeline_mode = #tpu.pipeline_mode<synchronous>, transform_indices = @transform_11, window_bounds = array<i64: 16, 128>}, {pipeline_mode = #tpu.pipeline_mode<synchronous>, transform_indices = @transform_12, window_bounds = array<i64: 2, 2, 32>}, {pipeline_mode = #tpu.pipeline_mode<synchronous>, transform_indices = @transform_13, window_bounds = array<i64: 2, 2, 32>}]} {
    %c0 = arith.constant 0 : index
    %c0_0 = arith.constant 0 : index
    %0 = vector.load %arg2[%c0, %c0_0] : memref<32x128xf32, #tpu.memory_space<vmem>>, vector<32x128xf32>
    %c0_1 = arith.constant 0 : index
    %c0_2 = arith.constant 0 : index
    %1 = vector.load %arg5[%c0_1, %c0_2] : memref<32x128xf32, #tpu.memory_space<vmem>>, vector<32x128xf32>
    %c0_3 = arith.constant 0 : index
    %c0_4 = arith.constant 0 : index
    %2 = vector.load %arg3[%c0_3, %c0_4] : memref<32x128xf32, #tpu.memory_space<vmem>>, vector<32x128xf32>
    %c0_5 = arith.constant 0 : index
    %c0_6 = arith.constant 0 : index
    %3 = vector.load %arg6[%c0_5, %c0_6] : memref<32x128xf32, #tpu.memory_space<vmem>>, vector<32x128xf32>
    %c0_7 = arith.constant 0 : index
    %c0_8 = arith.constant 0 : index
    %4 = vector.load %arg4[%c0_7, %c0_8] : memref<1x128xf32, #tpu.memory_space<vmem>>, vector<1x128xf32>
    %c0_9 = arith.constant 0 : index
    %c0_10 = arith.constant 0 : index
    %5 = vector.load %arg7[%c0_9, %c0_10] : memref<1x128xf32, #tpu.memory_space<vmem>>, vector<1x128xf32>
    %c0_11 = arith.constant 0 : index
    %c0_12 = arith.constant 0 : index
    %6 = vector.load %arg1[%c0_11, %c0_12] : memref<16x32xf32, #tpu.memory_space<vmem>>, vector<16x32xf32>
    %cst = arith.constant dense<0.000000e+00> : vector<16x128xf32>
    %7 = tpu.matmul %6, %0, %cst {dimension_numbers = #tpu.dot_dimension_numbers<[1], [0], [0], [1], [0, 0, 1, 1], [], []>} : vector<16x32xf32>, vector<32x128xf32>, vector<16x128xf32> -> vector<16x128xf32>
    %8 = vector.broadcast %4 : vector<1x128xf32> to vector<16x128xf32>
    %9 = arith.addf %7, %8 : vector<16x128xf32>
    %c0_13 = arith.constant 0 : index
    %c0_14 = arith.constant 0 : index
    %c0_15 = arith.constant 0 : index
    %10 = vector.load %arg8[%c0_13, %c0_14, %c0_15] : memref<2x2x32xf32, #tpu.memory_space<vmem>>, vector<1x2x32xf32>
    %11 = vector.shape_cast %10 : vector<1x2x32xf32> to vector<2x32xf32>
    %c1 = arith.constant 1 : index
    %c0_16 = arith.constant 0 : index
    %c0_17 = arith.constant 0 : index
    %12 = vector.load %arg8[%c1, %c0_16, %c0_17] : memref<2x2x32xf32, #tpu.memory_space<vmem>>, vector<1x2x32xf32>
    %13 = vector.shape_cast %12 : vector<1x2x32xf32> to vector<2x32xf32>
    %c0_18 = arith.constant 0 : index
    %c0_19 = arith.constant 0 : index
    %c0_20 = arith.constant 0 : index
    %14 = vector.load %arg9[%c0_18, %c0_19, %c0_20] : memref<2x2x32xf32, #tpu.memory_space<vmem>>, vector<1x2x32xf32>
    %15 = vector.shape_cast %14 : vector<1x2x32xf32> to vector<2x32xf32>
    %c1_21 = arith.constant 1 : index
    %c0_22 = arith.constant 0 : index
    %c0_23 = arith.constant 0 : index
    %16 = vector.load %arg9[%c1_21, %c0_22, %c0_23] : memref<2x2x32xf32, #tpu.memory_space<vmem>>, vector<1x2x32xf32>
    %17 = vector.shape_cast %16 : vector<1x2x32xf32> to vector<2x32xf32>
    %cst_24 = arith.constant dense<0.000000e+00> : vector<2x128xf32>
    %18 = tpu.matmul %11, %2, %cst_24 {dimension_numbers = #tpu.dot_dimension_numbers<[1], [0], [0], [1], [0, 0, 1, 1], [], []>} : vector<2x32xf32>, vector<32x128xf32>, vector<2x128xf32> -> vector<2x128xf32>
    %19 = vector.extract_strided_slice %9 {offsets = [0, 0], sizes = [2, 128], strides = [1, 1]} : vector<16x128xf32> to vector<2x128xf32>
    %20 = arith.addf %19, %18 : vector<2x128xf32>
    %21 = arith.negf %20 : vector<2x128xf32>
    %22 = math.exp %21 : vector<2x128xf32>
    %cst_25 = arith.constant 1.000000e+00 : f32
    %23 = vector.broadcast %cst_25 : f32 to vector<2x128xf32>
    %24 = arith.addf %23, %22 : vector<2x128xf32>
    %25 = arith.divf %23, %24 : vector<2x128xf32>
    %26 = math.tanh %20 : vector<2x128xf32>
    %27 = vector.extract_strided_slice %25 {offsets = [0, 0], sizes = [2, 32], strides = [1, 1]} : vector<2x128xf32> to vector<2x32xf32>
    %28 = vector.extract_strided_slice %25 {offsets = [0, 32], sizes = [2, 32], strides = [1, 1]} : vector<2x128xf32> to vector<2x32xf32>
    %29 = vector.extract_strided_slice %26 {offsets = [0, 64], sizes = [2, 32], strides = [1, 1]} : vector<2x128xf32> to vector<2x32xf32>
    %30 = vector.extract_strided_slice %25 {offsets = [0, 96], sizes = [2, 32], strides = [1, 1]} : vector<2x128xf32> to vector<2x32xf32>
    %31 = arith.mulf %28, %15 : vector<2x32xf32>
    %32 = arith.mulf %27, %29 : vector<2x32xf32>
    %33 = arith.addf %31, %32 : vector<2x32xf32>
    %34 = math.tanh %33 : vector<2x32xf32>
    %35 = arith.mulf %30, %34 : vector<2x32xf32>
    %cst_26 = arith.constant dense<0.000000e+00> : vector<2x128xf32>
    %36 = tpu.matmul %13, %3, %cst_26 {dimension_numbers = #tpu.dot_dimension_numbers<[1], [0], [0], [1], [0, 0, 1, 1], [], []>} : vector<2x32xf32>, vector<32x128xf32>, vector<2x128xf32> -> vector<2x128xf32>
    %cst_27 = arith.constant dense<0.000000e+00> : vector<2x128xf32>
    %37 = tpu.matmul %35, %1, %cst_27 {dimension_numbers = #tpu.dot_dimension_numbers<[1], [0], [0], [1], [0, 0, 1, 1], [], []>} : vector<2x32xf32>, vector<32x128xf32>, vector<2x128xf32> -> vector<2x128xf32>
    %38 = arith.addf %37, %36 : vector<2x128xf32>
    %39 = vector.broadcast %5 : vector<1x128xf32> to vector<2x128xf32>
    %40 = arith.addf %38, %39 : vector<2x128xf32>
    %41 = arith.negf %40 : vector<2x128xf32>
    %42 = math.exp %41 : vector<2x128xf32>
    %cst_28 = arith.constant 1.000000e+00 : f32
    %43 = vector.broadcast %cst_28 : f32 to vector<2x128xf32>
    %44 = arith.addf %43, %42 : vector<2x128xf32>
    %45 = arith.divf %43, %44 : vector<2x128xf32>
    %46 = math.tanh %40 : vector<2x128xf32>
    %47 = vector.extract_strided_slice %45 {offsets = [0, 0], sizes = [2, 32], strides = [1, 1]} : vector<2x128xf32> to vector<2x32xf32>
    %48 = vector.extract_strided_slice %45 {offsets = [0, 32], sizes = [2, 32], strides = [1, 1]} : vector<2x128xf32> to vector<2x32xf32>
    %49 = vector.extract_strided_slice %46 {offsets = [0, 64], sizes = [2, 32], strides = [1, 1]} : vector<2x128xf32> to vector<2x32xf32>
    %50 = vector.extract_strided_slice %45 {offsets = [0, 96], sizes = [2, 32], strides = [1, 1]} : vector<2x128xf32> to vector<2x32xf32>
    %51 = arith.mulf %48, %17 : vector<2x32xf32>
    %52 = arith.mulf %47, %49 : vector<2x32xf32>
    %53 = arith.addf %51, %52 : vector<2x32xf32>
    %54 = math.tanh %53 : vector<2x32xf32>
    %55 = arith.mulf %50, %54 : vector<2x32xf32>
    %c0_29 = arith.constant 0 : index
    %c0_30 = arith.constant 0 : index
    %56 = vector.load %arg15[%c0_29, %c0_30] : memref<16x32xf32, #tpu.memory_space<vmem>>, vector<2x32xf32>
    tpu.vector_store %arg15[%c0_29, %c0_30], %55 {strides = array<i32>} : memref<16x32xf32, #tpu.memory_space<vmem>>, vector<2x32xf32>,
    %cst_31 = arith.constant dense<0.000000e+00> : vector<2x128xf32>
    %57 = tpu.matmul %35, %2, %cst_31 {dimension_numbers = #tpu.dot_dimension_numbers<[1], [0], [0], [1], [0, 0, 1, 1], [], []>} : vector<2x32xf32>, vector<32x128xf32>, vector<2x128xf32> -> vector<2x128xf32>
    %58 = vector.extract_strided_slice %9 {offsets = [2, 0], sizes = [2, 128], strides = [1, 1]} : vector<16x128xf32> to vector<2x128xf32>
    %59 = arith.addf %58, %57 : vector<2x128xf32>
    %60 = arith.negf %59 : vector<2x128xf32>
    %61 = math.exp %60 : vector<2x128xf32>
    %cst_32 = arith.constant 1.000000e+00 : f32
    %62 = vector.broadcast %cst_32 : f32 to vector<2x128xf32>
    %63 = arith.addf %62, %61 : vector<2x128xf32>
    %64 = arith.divf %62, %63 : vector<2x128xf32>
    %65 = math.tanh %59 : vector<2x128xf32>
    %66 = vector.extract_strided_slice %64 {offsets = [0, 0], sizes = [2, 32], strides = [1, 1]} : vector<2x128xf32> to vector<2x32xf32>
    %67 = vector.extract_strided_slice %64 {offsets = [0, 32], sizes = [2, 32], strides = [1, 1]} : vector<2x128xf32> to vector<2x32xf32>
    %68 = vector.extract_strided_slice %65 {offsets = [0, 64], sizes = [2, 32], strides = [1, 1]} : vector<2x128xf32> to vector<2x32xf32>
    %69 = vector.extract_strided_slice %64 {offsets = [0, 96], sizes = [2, 32], strides = [1, 1]} : vector<2x128xf32> to vector<2x32xf32>
    %70 = arith.mulf %67, %33 : vector<2x32xf32>
    %71 = arith.mulf %66, %68 : vector<2x32xf32>
    %72 = arith.addf %70, %71 : vector<2x32xf32>
    %73 = math.tanh %72 : vector<2x32xf32>
    %74 = arith.mulf %69, %73 : vector<2x32xf32>
    %cst_33 = arith.constant dense<0.000000e+00> : vector<2x128xf32>
    %75 = tpu.matmul %55, %3, %cst_33 {dimension_numbers = #tpu.dot_dimension_numbers<[1], [0], [0], [1], [0, 0, 1, 1], [], []>} : vector<2x32xf32>, vector<32x128xf32>, vector<2x128xf32> -> vector<2x128xf32>
    %cst_34 = arith.constant dense<0.000000e+00> : vector<2x128xf32>
    %76 = tpu.matmul %74, %1, %cst_34 {dimension_numbers = #tpu.dot_dimension_numbers<[1], [0], [0], [1], [0, 0, 1, 1], [], []>} : vector<2x32xf32>, vector<32x128xf32>, vector<2x128xf32> -> vector<2x128xf32>
    %77 = arith.addf %76, %75 : vector<2x128xf32>
    %78 = vector.broadcast %5 : vector<1x128xf32> to vector<2x128xf32>
    %79 = arith.addf %77, %78 : vector<2x128xf32>
    %80 = arith.negf %79 : vector<2x128xf32>
    %81 = math.exp %80 : vector<2x128xf32>
    %cst_35 = arith.constant 1.000000e+00 : f32
    %82 = vector.broadcast %cst_35 : f32 to vector<2x128xf32>
    %83 = arith.addf %82, %81 : vector<2x128xf32>
    %84 = arith.divf %82, %83 : vector<2x128xf32>
    %85 = math.tanh %79 : vector<2x128xf32>
    %86 = vector.extract_strided_slice %84 {offsets = [0, 0], sizes = [2, 32], strides = [1, 1]} : vector<2x128xf32> to vector<2x32xf32>
    %87 = vector.extract_strided_slice %84 {offsets = [0, 32], sizes = [2, 32], strides = [1, 1]} : vector<2x128xf32> to vector<2x32xf32>
    %88 = vector.extract_strided_slice %85 {offsets = [0, 64], sizes = [2, 32], strides = [1, 1]} : vector<2x128xf32> to vector<2x32xf32>
    %89 = vector.extract_strided_slice %84 {offsets = [0, 96], sizes = [2, 32], strides = [1, 1]} : vector<2x128xf32> to vector<2x32xf32>
    %90 = arith.mulf %87, %53 : vector<2x32xf32>
    %91 = arith.mulf %86, %88 : vector<2x32xf32>
    %92 = arith.addf %90, %91 : vector<2x32xf32>
    %93 = math.tanh %92 : vector<2x32xf32>
    %94 = arith.mulf %89, %93 : vector<2x32xf32>
    %c2 = arith.constant 2 : index
    %c0_36 = arith.constant 0 : index
    %95 = vector.load %arg15[%c2, %c0_36] : memref<16x32xf32, #tpu.memory_space<vmem>>, vector<2x32xf32>
    tpu.vector_store %arg15[%c2, %c0_36], %94 {strides = array<i32>} : memref<16x32xf32, #tpu.memory_space<vmem>>, vector<2x32xf32>,
    %cst_37 = arith.constant dense<0.000000e+00> : vector<2x128xf32>
    %96 = tpu.matmul %74, %2, %cst_37 {dimension_numbers = #tpu.dot_dimension_numbers<[1], [0], [0], [1], [0, 0, 1, 1], [], []>} : vector<2x32xf32>, vector<32x128xf32>, vector<2x128xf32> -> vector<2x128xf32>
    %97 = vector.extract_strided_slice %9 {offsets = [4, 0], sizes = [2, 128], strides = [1, 1]} : vector<16x128xf32> to vector<2x128xf32>
    %98 = arith.addf %97, %96 : vector<2x128xf32>
    %99 = arith.negf %98 : vector<2x128xf32>
    %100 = math.exp %99 : vector<2x128xf32>
    %cst_38 = arith.constant 1.000000e+00 : f32
    %101 = vector.broadcast %cst_38 : f32 to vector<2x128xf32>
    %102 = arith.addf %101, %100 : vector<2x128xf32>
    %103 = arith.divf %101, %102 : vector<2x128xf32>
    %104 = math.tanh %98 : vector<2x128xf32>
    %105 = vector.extract_strided_slice %103 {offsets = [0, 0], sizes = [2, 32], strides = [1, 1]} : vector<2x128xf32> to vector<2x32xf32>
    %106 = vector.extract_strided_slice %103 {offsets = [0, 32], sizes = [2, 32], strides = [1, 1]} : vector<2x128xf32> to vector<2x32xf32>
    %107 = vector.extract_strided_slice %104 {offsets = [0, 64], sizes = [2, 32], strides = [1, 1]} : vector<2x128xf32> to vector<2x32xf32>
    %108 = vector.extract_strided_slice %103 {offsets = [0, 96], sizes = [2, 32], strides = [1, 1]} : vector<2x128xf32> to vector<2x32xf32>
    %109 = arith.mulf %106, %72 : vector<2x32xf32>
    %110 = arith.mulf %105, %107 : vector<2x32xf32>
    %111 = arith.addf %109, %110 : vector<2x32xf32>
    %112 = math.tanh %111 : vector<2x32xf32>
    %113 = arith.mulf %108, %112 : vector<2x32xf32>
    %cst_39 = arith.constant dense<0.000000e+00> : vector<2x128xf32>
    %114 = tpu.matmul %94, %3, %cst_39 {dimension_numbers = #tpu.dot_dimension_numbers<[1], [0], [0], [1], [0, 0, 1, 1], [], []>} : vector<2x32xf32>, vector<32x128xf32>, vector<2x128xf32> -> vector<2x128xf32>
    %cst_40 = arith.constant dense<0.000000e+00> : vector<2x128xf32>
    %115 = tpu.matmul %113, %1, %cst_40 {dimension_numbers = #tpu.dot_dimension_numbers<[1], [0], [0], [1], [0, 0, 1, 1], [], []>} : vector<2x32xf32>, vector<32x128xf32>, vector<2x128xf32> -> vector<2x128xf32>
    %116 = arith.addf %115, %114 : vector<2x128xf32>
    %117 = vector.broadcast %5 : vector<1x128xf32> to vector<2x128xf32>
    %118 = arith.addf %116, %117 : vector<2x128xf32>
    %119 = arith.negf %118 : vector<2x128xf32>
    %120 = math.exp %119 : vector<2x128xf32>
    %cst_41 = arith.constant 1.000000e+00 : f32
    %121 = vector.broadcast %cst_41 : f32 to vector<2x128xf32>
    %122 = arith.addf %121, %120 : vector<2x128xf32>
    %123 = arith.divf %121, %122 : vector<2x128xf32>
    %124 = math.tanh %118 : vector<2x128xf32>
    %125 = vector.extract_strided_slice %123 {offsets = [0, 0], sizes = [2, 32], strides = [1, 1]} : vector<2x128xf32> to vector<2x32xf32>
    %126 = vector.extract_strided_slice %123 {offsets = [0, 32], sizes = [2, 32], strides = [1, 1]} : vector<2x128xf32> to vector<2x32xf32>
    %127 = vector.extract_strided_slice %124 {offsets = [0, 64], sizes = [2, 32], strides = [1, 1]} : vector<2x128xf32> to vector<2x32xf32>
    %128 = vector.extract_strided_slice %123 {offsets = [0, 96], sizes = [2, 32], strides = [1, 1]} : vector<2x128xf32> to vector<2x32xf32>
    %129 = arith.mulf %126, %92 : vector<2x32xf32>
    %130 = arith.mulf %125, %127 : vector<2x32xf32>
    %131 = arith.addf %129, %130 : vector<2x32xf32>
    %132 = math.tanh %131 : vector<2x32xf32>
    %133 = arith.mulf %128, %132 : vector<2x32xf32>
    %c4 = arith.constant 4 : index
    %c0_42 = arith.constant 0 : index
    %134 = vector.load %arg15[%c4, %c0_42] : memref<16x32xf32, #tpu.memory_space<vmem>>, vector<2x32xf32>
    tpu.vector_store %arg15[%c4, %c0_42], %133 {strides = array<i32>} : memref<16x32xf32, #tpu.memory_space<vmem>>, vector<2x32xf32>,
    %cst_43 = arith.constant dense<0.000000e+00> : vector<2x128xf32>
    %135 = tpu.matmul %113, %2, %cst_43 {dimension_numbers = #tpu.dot_dimension_numbers<[1], [0], [0], [1], [0, 0, 1, 1], [], []>} : vector<2x32xf32>, vector<32x128xf32>, vector<2x128xf32> -> vector<2x128xf32>
    %136 = vector.extract_strided_slice %9 {offsets = [6, 0], sizes = [2, 128], strides = [1, 1]} : vector<16x128xf32> to vector<2x128xf32>
    %137 = arith.addf %136, %135 : vector<2x128xf32>
    %138 = arith.negf %137 : vector<2x128xf32>
    %139 = math.exp %138 : vector<2x128xf32>
    %cst_44 = arith.constant 1.000000e+00 : f32
    %140 = vector.broadcast %cst_44 : f32 to vector<2x128xf32>
    %141 = arith.addf %140, %139 : vector<2x128xf32>
    %142 = arith.divf %140, %141 : vector<2x128xf32>
    %143 = math.tanh %137 : vector<2x128xf32>
    %144 = vector.extract_strided_slice %142 {offsets = [0, 0], sizes = [2, 32], strides = [1, 1]} : vector<2x128xf32> to vector<2x32xf32>
    %145 = vector.extract_strided_slice %142 {offsets = [0, 32], sizes = [2, 32], strides = [1, 1]} : vector<2x128xf32> to vector<2x32xf32>
    %146 = vector.extract_strided_slice %143 {offsets = [0, 64], sizes = [2, 32], strides = [1, 1]} : vector<2x128xf32> to vector<2x32xf32>
    %147 = vector.extract_strided_slice %142 {offsets = [0, 96], sizes = [2, 32], strides = [1, 1]} : vector<2x128xf32> to vector<2x32xf32>
    %148 = arith.mulf %145, %111 : vector<2x32xf32>
    %149 = arith.mulf %144, %146 : vector<2x32xf32>
    %150 = arith.addf %148, %149 : vector<2x32xf32>
    %151 = math.tanh %150 : vector<2x32xf32>
    %152 = arith.mulf %147, %151 : vector<2x32xf32>
    %cst_45 = arith.constant dense<0.000000e+00> : vector<2x128xf32>
    %153 = tpu.matmul %133, %3, %cst_45 {dimension_numbers = #tpu.dot_dimension_numbers<[1], [0], [0], [1], [0, 0, 1, 1], [], []>} : vector<2x32xf32>, vector<32x128xf32>, vector<2x128xf32> -> vector<2x128xf32>
    %cst_46 = arith.constant dense<0.000000e+00> : vector<2x128xf32>
    %154 = tpu.matmul %152, %1, %cst_46 {dimension_numbers = #tpu.dot_dimension_numbers<[1], [0], [0], [1], [0, 0, 1, 1], [], []>} : vector<2x32xf32>, vector<32x128xf32>, vector<2x128xf32> -> vector<2x128xf32>
    %155 = arith.addf %154, %153 : vector<2x128xf32>
    %156 = vector.broadcast %5 : vector<1x128xf32> to vector<2x128xf32>
    %157 = arith.addf %155, %156 : vector<2x128xf32>
    %158 = arith.negf %157 : vector<2x128xf32>
    %159 = math.exp %158 : vector<2x128xf32>
    %cst_47 = arith.constant 1.000000e+00 : f32
    %160 = vector.broadcast %cst_47 : f32 to vector<2x128xf32>
    %161 = arith.addf %160, %159 : vector<2x128xf32>
    %162 = arith.divf %160, %161 : vector<2x128xf32>
    %163 = math.tanh %157 : vector<2x128xf32>
    %164 = vector.extract_strided_slice %162 {offsets = [0, 0], sizes = [2, 32], strides = [1, 1]} : vector<2x128xf32> to vector<2x32xf32>
    %165 = vector.extract_strided_slice %162 {offsets = [0, 32], sizes = [2, 32], strides = [1, 1]} : vector<2x128xf32> to vector<2x32xf32>
    %166 = vector.extract_strided_slice %163 {offsets = [0, 64], sizes = [2, 32], strides = [1, 1]} : vector<2x128xf32> to vector<2x32xf32>
    %167 = vector.extract_strided_slice %162 {offsets = [0, 96], sizes = [2, 32], strides = [1, 1]} : vector<2x128xf32> to vector<2x32xf32>
    %168 = arith.mulf %165, %131 : vector<2x32xf32>
    %169 = arith.mulf %164, %166 : vector<2x32xf32>
    %170 = arith.addf %168, %169 : vector<2x32xf32>
    %171 = math.tanh %170 : vector<2x32xf32>
    %172 = arith.mulf %167, %171 : vector<2x32xf32>
    %c6 = arith.constant 6 : index
    %c0_48 = arith.constant 0 : index
    %173 = vector.load %arg15[%c6, %c0_48] : memref<16x32xf32, #tpu.memory_space<vmem>>, vector<2x32xf32>
    tpu.vector_store %arg15[%c6, %c0_48], %172 {strides = array<i32>} : memref<16x32xf32, #tpu.memory_space<vmem>>, vector<2x32xf32>,
    %cst_49 = arith.constant dense<0.000000e+00> : vector<2x128xf32>
    %174 = tpu.matmul %152, %2, %cst_49 {dimension_numbers = #tpu.dot_dimension_numbers<[1], [0], [0], [1], [0, 0, 1, 1], [], []>} : vector<2x32xf32>, vector<32x128xf32>, vector<2x128xf32> -> vector<2x128xf32>
    %175 = vector.extract_strided_slice %9 {offsets = [8, 0], sizes = [2, 128], strides = [1, 1]} : vector<16x128xf32> to vector<2x128xf32>
    %176 = arith.addf %175, %174 : vector<2x128xf32>
    %177 = arith.negf %176 : vector<2x128xf32>
    %178 = math.exp %177 : vector<2x128xf32>
    %cst_50 = arith.constant 1.000000e+00 : f32
    %179 = vector.broadcast %cst_50 : f32 to vector<2x128xf32>
    %180 = arith.addf %179, %178 : vector<2x128xf32>
    %181 = arith.divf %179, %180 : vector<2x128xf32>
    %182 = math.tanh %176 : vector<2x128xf32>
    %183 = vector.extract_strided_slice %181 {offsets = [0, 0], sizes = [2, 32], strides = [1, 1]} : vector<2x128xf32> to vector<2x32xf32>
    %184 = vector.extract_strided_slice %181 {offsets = [0, 32], sizes = [2, 32], strides = [1, 1]} : vector<2x128xf32> to vector<2x32xf32>
    %185 = vector.extract_strided_slice %182 {offsets = [0, 64], sizes = [2, 32], strides = [1, 1]} : vector<2x128xf32> to vector<2x32xf32>
    %186 = vector.extract_strided_slice %181 {offsets = [0, 96], sizes = [2, 32], strides = [1, 1]} : vector<2x128xf32> to vector<2x32xf32>
    %187 = arith.mulf %184, %150 : vector<2x32xf32>
    %188 = arith.mulf %183, %185 : vector<2x32xf32>
    %189 = arith.addf %187, %188 : vector<2x32xf32>
    %190 = math.tanh %189 : vector<2x32xf32>
    %191 = arith.mulf %186, %190 : vector<2x32xf32>
    %cst_51 = arith.constant dense<0.000000e+00> : vector<2x128xf32>
    %192 = tpu.matmul %172, %3, %cst_51 {dimension_numbers = #tpu.dot_dimension_numbers<[1], [0], [0], [1], [0, 0, 1, 1], [], []>} : vector<2x32xf32>, vector<32x128xf32>, vector<2x128xf32> -> vector<2x128xf32>
    %cst_52 = arith.constant dense<0.000000e+00> : vector<2x128xf32>
    %193 = tpu.matmul %191, %1, %cst_52 {dimension_numbers = #tpu.dot_dimension_numbers<[1], [0], [0], [1], [0, 0, 1, 1], [], []>} : vector<2x32xf32>, vector<32x128xf32>, vector<2x128xf32> -> vector<2x128xf32>
    %194 = arith.addf %193, %192 : vector<2x128xf32>
    %195 = vector.broadcast %5 : vector<1x128xf32> to vector<2x128xf32>
    %196 = arith.addf %194, %195 : vector<2x128xf32>
    %197 = arith.negf %196 : vector<2x128xf32>
    %198 = math.exp %197 : vector<2x128xf32>
    %cst_53 = arith.constant 1.000000e+00 : f32
    %199 = vector.broadcast %cst_53 : f32 to vector<2x128xf32>
    %200 = arith.addf %199, %198 : vector<2x128xf32>
    %201 = arith.divf %199, %200 : vector<2x128xf32>
    %202 = math.tanh %196 : vector<2x128xf32>
    %203 = vector.extract_strided_slice %201 {offsets = [0, 0], sizes = [2, 32], strides = [1, 1]} : vector<2x128xf32> to vector<2x32xf32>
    %204 = vector.extract_strided_slice %201 {offsets = [0, 32], sizes = [2, 32], strides = [1, 1]} : vector<2x128xf32> to vector<2x32xf32>
    %205 = vector.extract_strided_slice %202 {offsets = [0, 64], sizes = [2, 32], strides = [1, 1]} : vector<2x128xf32> to vector<2x32xf32>
    %206 = vector.extract_strided_slice %201 {offsets = [0, 96], sizes = [2, 32], strides = [1, 1]} : vector<2x128xf32> to vector<2x32xf32>
    %207 = arith.mulf %204, %170 : vector<2x32xf32>
    %208 = arith.mulf %203, %205 : vector<2x32xf32>
    %209 = arith.addf %207, %208 : vector<2x32xf32>
    %210 = math.tanh %209 : vector<2x32xf32>
    %211 = arith.mulf %206, %210 : vector<2x32xf32>
    %c8 = arith.constant 8 : index
    %c0_54 = arith.constant 0 : index
    %212 = vector.load %arg15[%c8, %c0_54] : memref<16x32xf32, #tpu.memory_space<vmem>>, vector<2x32xf32>
    tpu.vector_store %arg15[%c8, %c0_54], %211 {strides = array<i32>} : memref<16x32xf32, #tpu.memory_space<vmem>>, vector<2x32xf32>,
    %cst_55 = arith.constant dense<0.000000e+00> : vector<2x128xf32>
    %213 = tpu.matmul %191, %2, %cst_55 {dimension_numbers = #tpu.dot_dimension_numbers<[1], [0], [0], [1], [0, 0, 1, 1], [], []>} : vector<2x32xf32>, vector<32x128xf32>, vector<2x128xf32> -> vector<2x128xf32>
    %214 = vector.extract_strided_slice %9 {offsets = [10, 0], sizes = [2, 128], strides = [1, 1]} : vector<16x128xf32> to vector<2x128xf32>
    %215 = arith.addf %214, %213 : vector<2x128xf32>
    %216 = arith.negf %215 : vector<2x128xf32>
    %217 = math.exp %216 : vector<2x128xf32>
    %cst_56 = arith.constant 1.000000e+00 : f32
    %218 = vector.broadcast %cst_56 : f32 to vector<2x128xf32>
    %219 = arith.addf %218, %217 : vector<2x128xf32>
    %220 = arith.divf %218, %219 : vector<2x128xf32>
    %221 = math.tanh %215 : vector<2x128xf32>
    %222 = vector.extract_strided_slice %220 {offsets = [0, 0], sizes = [2, 32], strides = [1, 1]} : vector<2x128xf32> to vector<2x32xf32>
    %223 = vector.extract_strided_slice %220 {offsets = [0, 32], sizes = [2, 32], strides = [1, 1]} : vector<2x128xf32> to vector<2x32xf32>
    %224 = vector.extract_strided_slice %221 {offsets = [0, 64], sizes = [2, 32], strides = [1, 1]} : vector<2x128xf32> to vector<2x32xf32>
    %225 = vector.extract_strided_slice %220 {offsets = [0, 96], sizes = [2, 32], strides = [1, 1]} : vector<2x128xf32> to vector<2x32xf32>
    %226 = arith.mulf %223, %189 : vector<2x32xf32>
    %227 = arith.mulf %222, %224 : vector<2x32xf32>
    %228 = arith.addf %226, %227 : vector<2x32xf32>
    %229 = math.tanh %228 : vector<2x32xf32>
    %230 = arith.mulf %225, %229 : vector<2x32xf32>
    %cst_57 = arith.constant dense<0.000000e+00> : vector<2x128xf32>
    %231 = tpu.matmul %211, %3, %cst_57 {dimension_numbers = #tpu.dot_dimension_numbers<[1], [0], [0], [1], [0, 0, 1, 1], [], []>} : vector<2x32xf32>, vector<32x128xf32>, vector<2x128xf32> -> vector<2x128xf32>
    %cst_58 = arith.constant dense<0.000000e+00> : vector<2x128xf32>
    %232 = tpu.matmul %230, %1, %cst_58 {dimension_numbers = #tpu.dot_dimension_numbers<[1], [0], [0], [1], [0, 0, 1, 1], [], []>} : vector<2x32xf32>, vector<32x128xf32>, vector<2x128xf32> -> vector<2x128xf32>
    %233 = arith.addf %232, %231 : vector<2x128xf32>
    %234 = vector.broadcast %5 : vector<1x128xf32> to vector<2x128xf32>
    %235 = arith.addf %233, %234 : vector<2x128xf32>
    %236 = arith.negf %235 : vector<2x128xf32>
    %237 = math.exp %236 : vector<2x128xf32>
    %cst_59 = arith.constant 1.000000e+00 : f32
    %238 = vector.broadcast %cst_59 : f32 to vector<2x128xf32>
    %239 = arith.addf %238, %237 : vector<2x128xf32>
    %240 = arith.divf %238, %239 : vector<2x128xf32>
    %241 = math.tanh %235 : vector<2x128xf32>
    %242 = vector.extract_strided_slice %240 {offsets = [0, 0], sizes = [2, 32], strides = [1, 1]} : vector<2x128xf32> to vector<2x32xf32>
    %243 = vector.extract_strided_slice %240 {offsets = [0, 32], sizes = [2, 32], strides = [1, 1]} : vector<2x128xf32> to vector<2x32xf32>
    %244 = vector.extract_strided_slice %241 {offsets = [0, 64], sizes = [2, 32], strides = [1, 1]} : vector<2x128xf32> to vector<2x32xf32>
    %245 = vector.extract_strided_slice %240 {offsets = [0, 96], sizes = [2, 32], strides = [1, 1]} : vector<2x128xf32> to vector<2x32xf32>
    %246 = arith.mulf %243, %209 : vector<2x32xf32>
    %247 = arith.mulf %242, %244 : vector<2x32xf32>
    %248 = arith.addf %246, %247 : vector<2x32xf32>
    %249 = math.tanh %248 : vector<2x32xf32>
    %250 = arith.mulf %245, %249 : vector<2x32xf32>
    %c10 = arith.constant 10 : index
    %c0_60 = arith.constant 0 : index
    %251 = vector.load %arg15[%c10, %c0_60] : memref<16x32xf32, #tpu.memory_space<vmem>>, vector<2x32xf32>
    tpu.vector_store %arg15[%c10, %c0_60], %250 {strides = array<i32>} : memref<16x32xf32, #tpu.memory_space<vmem>>, vector<2x32xf32>,
    %cst_61 = arith.constant dense<0.000000e+00> : vector<2x128xf32>
    %252 = tpu.matmul %230, %2, %cst_61 {dimension_numbers = #tpu.dot_dimension_numbers<[1], [0], [0], [1], [0, 0, 1, 1], [], []>} : vector<2x32xf32>, vector<32x128xf32>, vector<2x128xf32> -> vector<2x128xf32>
    %253 = vector.extract_strided_slice %9 {offsets = [12, 0], sizes = [2, 128], strides = [1, 1]} : vector<16x128xf32> to vector<2x128xf32>
    %254 = arith.addf %253, %252 : vector<2x128xf32>
    %255 = arith.negf %254 : vector<2x128xf32>
    %256 = math.exp %255 : vector<2x128xf32>
    %cst_62 = arith.constant 1.000000e+00 : f32
    %257 = vector.broadcast %cst_62 : f32 to vector<2x128xf32>
    %258 = arith.addf %257, %256 : vector<2x128xf32>
    %259 = arith.divf %257, %258 : vector<2x128xf32>
    %260 = math.tanh %254 : vector<2x128xf32>
    %261 = vector.extract_strided_slice %259 {offsets = [0, 0], sizes = [2, 32], strides = [1, 1]} : vector<2x128xf32> to vector<2x32xf32>
    %262 = vector.extract_strided_slice %259 {offsets = [0, 32], sizes = [2, 32], strides = [1, 1]} : vector<2x128xf32> to vector<2x32xf32>
    %263 = vector.extract_strided_slice %260 {offsets = [0, 64], sizes = [2, 32], strides = [1, 1]} : vector<2x128xf32> to vector<2x32xf32>
    %264 = vector.extract_strided_slice %259 {offsets = [0, 96], sizes = [2, 32], strides = [1, 1]} : vector<2x128xf32> to vector<2x32xf32>
    %265 = arith.mulf %262, %228 : vector<2x32xf32>
    %266 = arith.mulf %261, %263 : vector<2x32xf32>
    %267 = arith.addf %265, %266 : vector<2x32xf32>
    %268 = math.tanh %267 : vector<2x32xf32>
    %269 = arith.mulf %264, %268 : vector<2x32xf32>
    %cst_63 = arith.constant dense<0.000000e+00> : vector<2x128xf32>
    %270 = tpu.matmul %250, %3, %cst_63 {dimension_numbers = #tpu.dot_dimension_numbers<[1], [0], [0], [1], [0, 0, 1, 1], [], []>} : vector<2x32xf32>, vector<32x128xf32>, vector<2x128xf32> -> vector<2x128xf32>
    %cst_64 = arith.constant dense<0.000000e+00> : vector<2x128xf32>
    %271 = tpu.matmul %269, %1, %cst_64 {dimension_numbers = #tpu.dot_dimension_numbers<[1], [0], [0], [1], [0, 0, 1, 1], [], []>} : vector<2x32xf32>, vector<32x128xf32>, vector<2x128xf32> -> vector<2x128xf32>
    %272 = arith.addf %271, %270 : vector<2x128xf32>
    %273 = vector.broadcast %5 : vector<1x128xf32> to vector<2x128xf32>
    %274 = arith.addf %272, %273 : vector<2x128xf32>
    %275 = arith.negf %274 : vector<2x128xf32>
    %276 = math.exp %275 : vector<2x128xf32>
    %cst_65 = arith.constant 1.000000e+00 : f32
    %277 = vector.broadcast %cst_65 : f32 to vector<2x128xf32>
    %278 = arith.addf %277, %276 : vector<2x128xf32>
    %279 = arith.divf %277, %278 : vector<2x128xf32>
    %280 = math.tanh %274 : vector<2x128xf32>
    %281 = vector.extract_strided_slice %279 {offsets = [0, 0], sizes = [2, 32], strides = [1, 1]} : vector<2x128xf32> to vector<2x32xf32>
    %282 = vector.extract_strided_slice %279 {offsets = [0, 32], sizes = [2, 32], strides = [1, 1]} : vector<2x128xf32> to vector<2x32xf32>
    %283 = vector.extract_strided_slice %280 {offsets = [0, 64], sizes = [2, 32], strides = [1, 1]} : vector<2x128xf32> to vector<2x32xf32>
    %284 = vector.extract_strided_slice %279 {offsets = [0, 96], sizes = [2, 32], strides = [1, 1]} : vector<2x128xf32> to vector<2x32xf32>
    %285 = arith.mulf %282, %248 : vector<2x32xf32>
    %286 = arith.mulf %281, %283 : vector<2x32xf32>
    %287 = arith.addf %285, %286 : vector<2x32xf32>
    %288 = math.tanh %287 : vector<2x32xf32>
    %289 = arith.mulf %284, %288 : vector<2x32xf32>
    %c12 = arith.constant 12 : index
    %c0_66 = arith.constant 0 : index
    %290 = vector.load %arg15[%c12, %c0_66] : memref<16x32xf32, #tpu.memory_space<vmem>>, vector<2x32xf32>
    tpu.vector_store %arg15[%c12, %c0_66], %289 {strides = array<i32>} : memref<16x32xf32, #tpu.memory_space<vmem>>, vector<2x32xf32>,
    %cst_67 = arith.constant dense<0.000000e+00> : vector<2x128xf32>
    %291 = tpu.matmul %269, %2, %cst_67 {dimension_numbers = #tpu.dot_dimension_numbers<[1], [0], [0], [1], [0, 0, 1, 1], [], []>} : vector<2x32xf32>, vector<32x128xf32>, vector<2x128xf32> -> vector<2x128xf32>
    %292 = vector.extract_strided_slice %9 {offsets = [14, 0], sizes = [2, 128], strides = [1, 1]} : vector<16x128xf32> to vector<2x128xf32>
    %293 = arith.addf %292, %291 : vector<2x128xf32>
    %294 = arith.negf %293 : vector<2x128xf32>
    %295 = math.exp %294 : vector<2x128xf32>
    %cst_68 = arith.constant 1.000000e+00 : f32
    %296 = vector.broadcast %cst_68 : f32 to vector<2x128xf32>
    %297 = arith.addf %296, %295 : vector<2x128xf32>
    %298 = arith.divf %296, %297 : vector<2x128xf32>
    %299 = math.tanh %293 : vector<2x128xf32>
    %300 = vector.extract_strided_slice %298 {offsets = [0, 0], sizes = [2, 32], strides = [1, 1]} : vector<2x128xf32> to vector<2x32xf32>
    %301 = vector.extract_strided_slice %298 {offsets = [0, 32], sizes = [2, 32], strides = [1, 1]} : vector<2x128xf32> to vector<2x32xf32>
    %302 = vector.extract_strided_slice %299 {offsets = [0, 64], sizes = [2, 32], strides = [1, 1]} : vector<2x128xf32> to vector<2x32xf32>
    %303 = vector.extract_strided_slice %298 {offsets = [0, 96], sizes = [2, 32], strides = [1, 1]} : vector<2x128xf32> to vector<2x32xf32>
    %304 = arith.mulf %301, %267 : vector<2x32xf32>
    %305 = arith.mulf %300, %302 : vector<2x32xf32>
    %306 = arith.addf %304, %305 : vector<2x32xf32>
    %307 = math.tanh %306 : vector<2x32xf32>
    %308 = arith.mulf %303, %307 : vector<2x32xf32>
    %cst_69 = arith.constant dense<0.000000e+00> : vector<2x128xf32>
    %309 = tpu.matmul %289, %3, %cst_69 {dimension_numbers = #tpu.dot_dimension_numbers<[1], [0], [0], [1], [0, 0, 1, 1], [], []>} : vector<2x32xf32>, vector<32x128xf32>, vector<2x128xf32> -> vector<2x128xf32>
    %cst_70 = arith.constant dense<0.000000e+00> : vector<2x128xf32>
    %310 = tpu.matmul %308, %1, %cst_70 {dimension_numbers = #tpu.dot_dimension_numbers<[1], [0], [0], [1], [0, 0, 1, 1], [], []>} : vector<2x32xf32>, vector<32x128xf32>, vector<2x128xf32> -> vector<2x128xf32>
    %311 = arith.addf %310, %309 : vector<2x128xf32>
    %312 = vector.broadcast %5 : vector<1x128xf32> to vector<2x128xf32>
    %313 = arith.addf %311, %312 : vector<2x128xf32>
    %314 = arith.negf %313 : vector<2x128xf32>
    %315 = math.exp %314 : vector<2x128xf32>
    %cst_71 = arith.constant 1.000000e+00 : f32
    %316 = vector.broadcast %cst_71 : f32 to vector<2x128xf32>
    %317 = arith.addf %316, %315 : vector<2x128xf32>
    %318 = arith.divf %316, %317 : vector<2x128xf32>
    %319 = math.tanh %313 : vector<2x128xf32>
    %320 = vector.extract_strided_slice %318 {offsets = [0, 0], sizes = [2, 32], strides = [1, 1]} : vector<2x128xf32> to vector<2x32xf32>
    %321 = vector.extract_strided_slice %318 {offsets = [0, 32], sizes = [2, 32], strides = [1, 1]} : vector<2x128xf32> to vector<2x32xf32>
    %322 = vector.extract_strided_slice %319 {offsets = [0, 64], sizes = [2, 32], strides = [1, 1]} : vector<2x128xf32> to vector<2x32xf32>
    %323 = vector.extract_strided_slice %318 {offsets = [0, 96], sizes = [2, 32], strides = [1, 1]} : vector<2x128xf32> to vector<2x32xf32>
    %324 = arith.mulf %321, %287 : vector<2x32xf32>
    %325 = arith.mulf %320, %322 : vector<2x32xf32>
    %326 = arith.addf %324, %325 : vector<2x32xf32>
    %327 = math.tanh %326 : vector<2x32xf32>
    %328 = arith.mulf %323, %327 : vector<2x32xf32>
    %c14 = arith.constant 14 : index
    %c0_72 = arith.constant 0 : index
    %329 = vector.load %arg15[%c14, %c0_72] : memref<16x32xf32, #tpu.memory_space<vmem>>, vector<2x32xf32>
    tpu.vector_store %arg15[%c14, %c0_72], %328 {strides = array<i32>} : memref<16x32xf32, #tpu.memory_space<vmem>>, vector<2x32xf32>,
    %c0_73 = arith.constant 0 : index
    %c0_74 = arith.constant 0 : index
    %c0_75 = arith.constant 0 : index
    %330 = vector.load %arg13[%c0_73, %c0_74, %c0_75] : memref<2x2x32xf32, #tpu.memory_space<vmem>>, vector<1x2x32xf32>
    %331 = vector.shape_cast %330 : vector<1x2x32xf32> to vector<2x32xf32>
    %332 = vector.shape_cast %308 : vector<2x32xf32> to vector<1x2x32xf32>
    tpu.vector_store %arg13[%c0_73, %c0_74, %c0_75], %332 {strides = array<i32>} : memref<2x2x32xf32, #tpu.memory_space<vmem>>, vector<1x2x32xf32>,
    %c0_76 = arith.constant 0 : index
    %c0_77 = arith.constant 0 : index
    %c0_78 = arith.constant 0 : index
    %333 = vector.load %arg14[%c0_76, %c0_77, %c0_78] : memref<2x2x32xf32, #tpu.memory_space<vmem>>, vector<1x2x32xf32>
    %334 = vector.shape_cast %333 : vector<1x2x32xf32> to vector<2x32xf32>
    %335 = vector.shape_cast %306 : vector<2x32xf32> to vector<1x2x32xf32>
    tpu.vector_store %arg14[%c0_76, %c0_77, %c0_78], %335 {strides = array<i32>} : memref<2x2x32xf32, #tpu.memory_space<vmem>>, vector<1x2x32xf32>,
    %c1_79 = arith.constant 1 : index
    %c0_80 = arith.constant 0 : index
    %c0_81 = arith.constant 0 : index
    %336 = vector.load %arg13[%c1_79, %c0_80, %c0_81] : memref<2x2x32xf32, #tpu.memory_space<vmem>>, vector<1x2x32xf32>
    %337 = vector.shape_cast %336 : vector<1x2x32xf32> to vector<2x32xf32>
    %338 = vector.shape_cast %328 : vector<2x32xf32> to vector<1x2x32xf32>
    tpu.vector_store %arg13[%c1_79, %c0_80, %c0_81], %338 {strides = array<i32>} : memref<2x2x32xf32, #tpu.memory_space<vmem>>, vector<1x2x32xf32>,
    %c1_82 = arith.constant 1 : index
    %c0_83 = arith.constant 0 : index
    %c0_84 = arith.constant 0 : index
    %339 = vector.load %arg14[%c1_82, %c0_83, %c0_84] : memref<2x2x32xf32, #tpu.memory_space<vmem>>, vector<1x2x32xf32>
    %340 = vector.shape_cast %339 : vector<1x2x32xf32> to vector<2x32xf32>
    %341 = vector.shape_cast %326 : vector<2x32xf32> to vector<1x2x32xf32>
    tpu.vector_store %arg14[%c1_82, %c0_83, %c0_84], %341 {strides = array<i32>} : memref<2x2x32xf32, #tpu.memory_space<vmem>>, vector<1x2x32xf32>,
    %c0_85 = arith.constant 0 : index
    %c0_86 = arith.constant 0 : index
    %342 = vector.load %arg15[%c0_85, %c0_86] : memref<16x32xf32, #tpu.memory_space<vmem>>, vector<16x32xf32>
    %c0_87 = arith.constant 0 : index
    %c0_88 = arith.constant 0 : index
    %343 = vector.load %arg10[%c0_87, %c0_88] : memref<32x128xf32, #tpu.memory_space<vmem>>, vector<32x128xf32>
    %cst_89 = arith.constant dense<0.000000e+00> : vector<16x128xf32>
    %344 = tpu.matmul %342, %343, %cst_89 {dimension_numbers = #tpu.dot_dimension_numbers<[1], [0], [0], [1], [0, 0, 1, 1], [], []>} : vector<16x32xf32>, vector<32x128xf32>, vector<16x128xf32> -> vector<16x128xf32>
    %c0_90 = arith.constant 0 : index
    %c0_91 = arith.constant 0 : index
    %345 = vector.load %arg11[%c0_90, %c0_91] : memref<1x128xf32, #tpu.memory_space<vmem>>, vector<1x128xf32>
    %346 = vector.broadcast %345 : vector<1x128xf32> to vector<16x128xf32>
    %347 = arith.addf %344, %346 : vector<16x128xf32>
    %c0_92 = arith.constant 0 : index
    %c0_93 = arith.constant 0 : index
    %348 = vector.load %arg12[%c0_92, %c0_93] : memref<16x128xf32, #tpu.memory_space<vmem>>, vector<16x128xf32>
    tpu.vector_store %arg12[%c0_92, %c0_93], %347 {strides = array<i32>} : memref<16x128xf32, #tpu.memory_space<vmem>>, vector<16x128xf32>,
    return
  }
  func.func @transform_0(%arg0: i32) -> (i32, i32) {
    %c0_i32 = arith.constant 0 : i32
    %c0_i32_0 = arith.constant 0 : i32
    %c0_i32_1 = arith.constant 0 : i32
    return %c0_i32, %c0_i32_0 : i32, i32
  }
  func.func @transform_1(%arg0: i32) -> (i32, i32) {
    %c0_i32 = arith.constant 0 : i32
    %c0_i32_0 = arith.constant 0 : i32
    %c0_i32_1 = arith.constant 0 : i32
    return %c0_i32, %c0_i32_0 : i32, i32
  }
  func.func @transform_2(%arg0: i32) -> (i32, i32) {
    %c0_i32 = arith.constant 0 : i32
    %c0_i32_0 = arith.constant 0 : i32
    %c0_i32_1 = arith.constant 0 : i32
    return %c0_i32, %c0_i32_0 : i32, i32
  }
  func.func @transform_3(%arg0: i32) -> (i32, i32) {
    %c0_i32 = arith.constant 0 : i32
    %c0_i32_0 = arith.constant 0 : i32
    %c0_i32_1 = arith.constant 0 : i32
    return %c0_i32, %c0_i32_0 : i32, i32
  }
  func.func @transform_4(%arg0: i32) -> (i32, i32) {
    %c0_i32 = arith.constant 0 : i32
    %c0_i32_0 = arith.constant 0 : i32
    %c0_i32_1 = arith.constant 0 : i32
    return %c0_i32, %c0_i32_0 : i32, i32
  }
  func.func @transform_5(%arg0: i32) -> (i32, i32) {
    %c0_i32 = arith.constant 0 : i32
    %c0_i32_0 = arith.constant 0 : i32
    %c0_i32_1 = arith.constant 0 : i32
    return %c0_i32, %c0_i32_0 : i32, i32
  }
  func.func @transform_6(%arg0: i32) -> (i32, i32) {
    %c0_i32 = arith.constant 0 : i32
    %c0_i32_0 = arith.constant 0 : i32
    %c0_i32_1 = arith.constant 0 : i32
    return %c0_i32, %c0_i32_0 : i32, i32
  }
  func.func @transform_7(%arg0: i32) -> (i32, i32, i32) {
    %c0_i32 = arith.constant 0 : i32
    %c0_i32_0 = arith.constant 0 : i32
    %c0_i32_1 = arith.constant 0 : i32
    %c0_i32_2 = arith.constant 0 : i32
    return %c0_i32, %c0_i32_0, %c0_i32_1 : i32, i32, i32
  }
  func.func @transform_8(%arg0: i32) -> (i32, i32, i32) {
    %c0_i32 = arith.constant 0 : i32
    %c0_i32_0 = arith.constant 0 : i32
    %c0_i32_1 = arith.constant 0 : i32
    %c0_i32_2 = arith.constant 0 : i32
    return %c0_i32, %c0_i32_0, %c0_i32_1 : i32, i32, i32
  }
  func.func @transform_9(%arg0: i32) -> (i32, i32) {
    %c0_i32 = arith.constant 0 : i32
    %c0_i32_0 = arith.constant 0 : i32
    %c0_i32_1 = arith.constant 0 : i32
    return %c0_i32, %c0_i32_0 : i32, i32
  }
  func.func @transform_10(%arg0: i32) -> (i32, i32) {
    %c0_i32 = arith.constant 0 : i32
    %c0_i32_0 = arith.constant 0 : i32
    %c0_i32_1 = arith.constant 0 : i32
    return %c0_i32, %c0_i32_0 : i32, i32
  }
  func.func @transform_11(%arg0: i32) -> (i32, i32) {
    %c0_i32 = arith.constant 0 : i32
    %c0_i32_0 = arith.constant 0 : i32
    %c0_i32_1 = arith.constant 0 : i32
    return %c0_i32, %c0_i32_0 : i32, i32
  }
  func.func @transform_12(%arg0: i32) -> (i32, i32, i32) {
    %c0_i32 = arith.constant 0 : i32
    %c0_i32_0 = arith.constant 0 : i32
    %c0_i32_1 = arith.constant 0 : i32
    %c0_i32_2 = arith.constant 0 : i32
    return %c0_i32, %c0_i32_0, %c0_i32_1 : i32, i32, i32
  }
  func.func @transform_13(%arg0: i32) -> (i32, i32, i32) {
    %c0_i32 = arith.constant 0 : i32
    %c0_i32_0 = arith.constant 0 : i32
    %c0_i32_1 = arith.constant 0 : i32
    %c0_i32_2 = arith.constant 0 : i32
    return %c0_i32, %c0_i32_0, %c0_i32_1 : i32, i32, i32
  }
}

</mosaic_0001>

<bundles_post_ra>
// kernel: merged_encoder_forward.1
= control target key start
LH: loop header
LB: loop body
LE: loop exit
PB: predicated region body
PF: predicated region fallthrough
CT: control target
= control target key end

     0   :  { %19 = vsyncpa [#allocation4], 0  ;;  %s4071_s0 = inlined_call_operand.vmem [shape: f32[16,32], index: 0, kind: input, shape index: {}]   ;;  %s4072_s1 = inlined_call_operand.vmem [shape: f32[32,128], index: 1, kind: input, shape index: {}]   ;;  %s4073_s2 = inlined_call_operand.hbm [shape: f32[32,128], index: 2, kind: input, shape index: {}]   ;;  %s4074_s3 = inlined_call_operand.vmem [shape: f32[1,128], index: 3, kind: input, shape index: {}]   ;;  %s4075_s4 = inlined_call_operand.hbm [shape: f32[32,128], index: 4, kind: input, shape index: {}]   ;;  %s4076_s5 = inlined_call_operand.hbm [shape: f32[32,128], index: 5, kind: input, shape index: {}]   ;;  %s4077_s6 = inlined_call_operand.hbm [shape: f32[1,128], index: 6, kind: input, shape index: {}]   ;;  %s4078_s7 = inlined_call_operand.hbm [shape: f32[2,2,32], index: 7, kind: input, shape index: {}]   ;;  %s4079_s8 = inlined_call_operand.vmem [shape: f32[2,2,32], index: 8, kind: input, shape index: {}]   ;;  %s4080_s9 = inlined_call_operand.hbm [shape: f32[32,128], index: 9, kind: input, shape index: {}]   ;;  %s4081_s10 = inlined_call_operand.hbm [shape: f32[1,128], index: 10, kind: input, shape index: {}]   ;;  %s4082_s11 = inlined_call_operand.vmem [shape: f32[16,128], index: 11, kind: output, shape index: {0}]   ;;  %s4083_s12 = inlined_call_operand.hbm [shape: f32[2,2,32], index: 12, kind: output, shape index: {1}]   ;;  %s4084_s13 = inlined_call_operand.hbm [shape: f32[2,2,32], index: 13, kind: output, shape index: {2}]  }
   0x1   :  { %20 = vsyncpa [#allocation7], 0 }
   0x2   :  { %21 = vsyncpa [#allocation10], 0 }
   0x3   :  { %22 = vsyncpa [#allocation13], 0 }
   0x4   :  { %23 = vsyncpa [#allocation5], 0 }
   0x5   :  { %24 = vsyncpa [#allocation17], 0  ;;  %s3458_s25 = smov [#allocation6]   ;;  %s3459_s27 = smov [#allocation9]  }
   0x6   :  { %s48_s26 = sshll.u32 %s3458_s25, 4  ;;  %s73_s28 = sshll.u32 %s3459_s27, 4  ;;  %s49_s26 = int_to_ptr.vmem [resolvable:$true] %s48_s26  ;;  %s74_s28 = int_to_ptr.vmem [resolvable:$true] %s73_s28 }
   0x7   :  { %s3274_s29 = scalar_lea.vmem %s49_s26, 512  ;;  %p3279_p1 = scmp.lt.s32.totalorder %s49_s26, %s49_s26 }
   0x8   :  { %p3275_p0 = scmp.ne.s32.totalorder %s49_s26, %s3274_s29  ;;  %p3280_p2 = scmp.lt.s32.totalorder %s3274_s29, %s3274_s29 }
   0xa   :  { %p3281_p3 = por %p3280_p2, %p3279_p1 }
   0xc   :  { %p3282_p4 = pnand %p3281_p3, %p3275_p0 }
   0xe   :  { %3285 = shalt.err (!%p3282_p4)
}
   0xf   :  { %s3460_s30 = smov 128   ;;  %s3461_s14 = smov 8  }
  0x10   :  { %54 = dma.hbm_to_vmem [thread:$0]  %s4075_s4, 512, %s49_s26, [#allocation7], %s3460_s30, %s3460_s30, %s3461_s14  }
  0x11   :  { %s3294_s17 = scalar_lea.vmem %s74_s28, 16  ;;  %s3298_s18 = scalar_lea.vmem %s74_s28, 32 }
  0x12   :  { %p3295_p5 = scmp.ne.s32.totalorder %s74_s28, %s3294_s17  ;;  %p3299_p6 = scmp.lt.s32.totalorder %s74_s28, %s74_s28 }
  0x13   :  { %p3300_p7 = scmp.lt.s32.totalorder %s3298_s18, %s3294_s17 }
  0x15   :  { %p3301_p8 = por %p3300_p7, %p3299_p6 }
  0x17   :  { %p3302_p9 = pnand %p3301_p8, %p3295_p5 }
  0x19   :  { %3305 = shalt.err (!%p3302_p9)
}
  0x1a   :  { %76 = dma.hbm_to_vmem [thread:$0]  %s4077_s6, 16, %s74_s28, [#allocation10]  }
  0x1b   :  { %s3462_s21 = smov [#allocation12]   ;;  %s3463_s23 = smov [#allocation3]  }
  0x1c   :  { %s96_s22 = sshll.u32 %s3462_s21, 4  ;;  %s34_s24 = sshll.u32 %s3463_s23, 4  ;;  %s97_s22 = int_to_ptr.vmem [resolvable:$true] %s96_s22  ;;  %s35_s24 = int_to_ptr.vmem [resolvable:$true] %s34_s24 }
  0x1d   :  { %s3314_s25 = scalar_lea.vmem %s97_s22, 512  ;;  %p3319_p11 = scmp.lt.s32.totalorder %s97_s22, %s97_s22 }
  0x1e   :  { %p3315_p10 = scmp.ne.s32.totalorder %s97_s22, %s3314_s25  ;;  %p3320_p12 = scmp.lt.s32.totalorder %s3314_s25, %s3314_s25 }
  0x20   :  { %p3321_p13 = por %p3320_p12, %p3319_p11 }
  0x22   :  { %p3322_p0 = pnand %p3321_p13, %p3315_p10 }
  0x24   :  { %3325 = shalt.err (!%p3322_p0)
}
  0x25   :  { %102 = dma.hbm_to_vmem [thread:$0]  %s4080_s9, 512, %s97_s22, [#allocation13], %s3460_s30, %s3460_s30, %s3461_s14  }
  0x26   :  { %s3334_s6 = scalar_lea.vmem %s35_s24, 512  ;;  %p3339_p2 = scmp.lt.s32.totalorder %s35_s24, %s35_s24 }
  0x27   :  { %p3335_p1 = scmp.ne.s32.totalorder %s35_s24, %s3334_s6  ;;  %p3340_p3 = scmp.lt.s32.totalorder %s3334_s6, %s3334_s6 }
  0x29   :  { %p3341_p4 = por %p3340_p3, %p3339_p2 }
  0x2b   :  { %p3342_p5 = pnand %p3341_p4, %p3335_p1 }
  0x2d   :  { %3345 = shalt.err (!%p3342_p5)
}
  0x2e   :  { %40 = dma.hbm_to_vmem [thread:$0]  %s4073_s2, 512, %s35_s24, [#allocation4], %s3460_s30, %s3460_s30, %s3461_s14  }
  0x2f   :  { %s3464_s29 = smov [#allocation8]   ;;  %s3465_s16 = smov [#allocation11]  }
  0x30   :  { %s60_s15 = sshll.u32 %s3464_s29, 4  ;;  %s82_s17 = sshll.u32 %s3465_s16, 4  ;;  %s61_s15 = int_to_ptr.vmem [resolvable:$true] %s60_s15  ;;  %s83_s17 = int_to_ptr.vmem [resolvable:$true] %s82_s17 }
  0x31   :  { %s3354_s9 = scalar_lea.vmem %s61_s15, 512  ;;  %p3359_p7 = scmp.lt.s32.totalorder %s61_s15, %s61_s15 }
  0x32   :  { %p3355_p6 = scmp.ne.s32.totalorder %s61_s15, %s3354_s9  ;;  %p3360_p8 = scmp.lt.s32.totalorder %s3354_s9, %s3354_s9 }
  0x34   :  { %p3361_p9 = por %p3360_p8, %p3359_p7 }
  0x36   :  { %p3362_p10 = pnand %p3361_p9, %p3355_p6 }
  0x38   :  { %3365 = shalt.err (!%p3362_p10)
}
  0x39   :  { %66 = dma.hbm_to_vmem [thread:$0]  %s4076_s5, 512, %s61_s15, [#allocation7], %s3460_s30, %s3460_s30, %s3461_s14  }
  0x3a   :  { %s3374_s2 = scalar_lea.vmem %s83_s17, 64  ;;  %p3379_p12 = scmp.lt.s32.totalorder %s83_s17, %s83_s17 }
  0x3b   :  { %p3375_p11 = scmp.ne.s32.totalorder %s83_s17, %s3374_s2  ;;  %p3380_p13 = scmp.lt.s32.totalorder %s3374_s2, %s3374_s2 }
  0x3d   :  { %p3381_p0 = por %p3380_p13, %p3379_p12 }
  0x3f   :  { %p3382_p1 = pnand %p3381_p0, %p3375_p11 }
  0x41   :  { %3385 = shalt.err (!%p3382_p1)
}
  0x42   :  { %s3466_s20 = smov 32   ;;  %s3467_s21 = smov 2  }
  0x43   :  { %88 = dma.hbm_to_vmem [thread:$0]  %s4078_s7, 64, %s83_s17, [#allocation10], %s3466_s20, %s3466_s20, %s3467_s21  }
  0x44   :  { %s3468_s24 = smov [#allocation14]  }
  0x45   :  { %s109_s25 = sshll.u32 %s3468_s24, 4  ;;  %s110_s25 = int_to_ptr.vmem [resolvable:$true] %s109_s25 }
  0x46   :  { %s3394_s5 = scalar_lea.vmem %s110_s25, 16  ;;  %s3398_s30 = scalar_lea.vmem %s110_s25, 32 }
  0x47   :  { %p3395_p2 = scmp.ne.s32.totalorder %s110_s25, %s3394_s5  ;;  %p3399_p3 = scmp.lt.s32.totalorder %s110_s25, %s110_s25 }
  0x48   :  { %p3400_p4 = scmp.lt.s32.totalorder %s3398_s30, %s3394_s5 }
  0x4a   :  { %p3401_p5 = por %p3400_p4, %p3399_p3 }
  0x4c   :  { %p3402_p6 = pnand %p3401_p5, %p3395_p2 }
  0x4e   :  { %3405 = shalt.err (!%p3402_p6)
}
  0x4f   :  { %112 = dma.hbm_to_vmem [thread:$0]  %s4081_s10, 16, %s110_s25, [#allocation13]  }
  0x50   :  { %3446 = dma.done.wait [#allocation4], 512  }
  0x51   :  { %3447 = vsyncadd [#allocation4], 4294966784 }
  0x52   :  { %3448 = dma.done.wait [#allocation7], 1024  }
  0x53   :  { %3449 = vsyncadd [#allocation7], 4294966272 }
  0x54   :  { %3450 = dma.done.wait [#allocation10], 80  }
  0x55   :  { %3451 = vsyncadd [#allocation10], 4294967216 }
  0x56   :  { %3452 = dma.done.wait [#allocation13], 528  }
  0x57   :  { %3453 = vsyncadd [#allocation13], 4294966768  ;;  %v3469_v0 = vmov 0.0   ;;  %vm3470_vm0 = vmmov 0   ;;  %v137_v1 = vld [vmem:[%s4072_s1 + $0x18] sm:$0xff]  ;;  %v136_v2 = vld [vmem:[%s4072_s1 + $0x10] sm:$0xff] }
  0x58   :  { %2833 = vmatprep.subr.mxu1 %v3469_v0  ;;  %2841 = vmatprep.mubr.msk.f32.mxu1 %vm3470_vm0, %v3469_v0  ;;  %v3590_v3 = vld [vmem:[#allocation3 + $0x18] sm:$0xff]  ;;  %v3593_v4 = vld [vmem:[#allocation3 + $0x10] sm:$0xff]  ;;  %vm160_vm1 = vcmask 261120   ;;  %v3603_v7 = vld [vmem:[#allocation3 + $0x8] sm:$0xff]  ;;  %s3471_s19 = smov 64   ;;  %vm537_vm2 = vcmask 254976  }
  0x59   :  { %2822 = vmatprep.subr.mxu0 %v137_v1  ;;  %2834 = vmatpush3.msra.mxu1 %v3590_v3  ;;  %v135_v5 = vld [vmem:[%s4072_s1 + $0x8] sm:$0xff]  ;;  %v152_v6 = vld [vmem:[%s4071_s0] sm:$0xff]  ;;  %v3610_v9 = vld [vmem:[#allocation3] sm:$0xff]  ;;  %vm2491_vm3 = vcmask 261126   ;;  %s3473_s24 = smov [#allocation15]   ;;  %s3474_s5 = smov [#allocation16]  }
  0x5a   :  { %2823 = vmatpush3.msra.mxu0 %v137_v1  ;;  %2835 = vmatprep.subr.mxu1 %v3469_v0  ;;  %v134_v8 = vld [vmem:[%s4072_s1] sm:$0xff]  ;;  %v153_v10 = vld [vmem:[%s4071_s0 + $0x8] sm:$0xff]  ;;  %v242_v11 = vld [vmem:[#allocation11] sm:$0x3]  ;;  %s2609_s25 = sshll.u32 %s3473_s24, 4  ;;  %s2621_s30 = sshll.u32 %s3474_s5, 4  ;;  %s2610_s25 = int_to_ptr.vmem [resolvable:$true] %s2609_s25  ;;  %s2622_s30 = int_to_ptr.vmem [resolvable:$true] %s2621_s30 }
  0x5b   :  { %2824 = vmatprep.subr.mxu0 %v136_v2  ;;  %2836 = vmatpush3.msra.mxu1 %v3593_v4  ;;  %v2642_v12 = vld [vmem:[%s4074_s3] ss:$0 sm:$0xff]  ;;  %v3643_v32 = vld [vmem:[#allocation8 + $0x18] sm:$0xff]  ;;  %v3651_v35 = vld [vmem:[#allocation8 + $0x8] sm:$0xff]  ;;  %s3406_s14 = scalar_lea.vmem %s2610_s25, 64  ;;  %p3411_p8 = scmp.lt.s32.totalorder %s2610_s25, %s2610_s25 }
  0x5c   :  { %2825 = vmatpush3.msra.mxu0 %v136_v2  ;;  %2837 = vmatprep.subr.mxu1 %v3469_v0  ;;  %v245_v21 = vld [vmem:[%s4079_s8] sm:$0x3]  ;;  %v3648_v34 = vld [vmem:[#allocation6 + $0x18] sm:$0xff]  ;;  %v3658_v37 = vld [vmem:[#allocation6 + $0x8] sm:$0xff]  ;;  %p3407_p7 = scmp.ne.s32.totalorder %s2610_s25, %s3406_s14  ;;  %p3412_p9 = scmp.lt.s32.totalorder %s3406_s14, %s3406_s14 }
  0x5d   :  { %2826 = vmatprep.subr.mxu0 %v135_v5  ;;  %2830 = vmatprep.mubr.msk.f32.mxu0 %vm160_vm1, %v152_v6  ;;  %v3645_v33 = vld [vmem:[#allocation8 + $0x10] sm:$0xff]  ;;  %v3661_v38 = vld [vmem:[#allocation8] sm:$0xff] }
  0x5e   :  { %2827 = vmatpush3.msra.mxu0 %v135_v5  ;;  %2838 = vmatpush3.msra.mxu1 %v3603_v7  ;;  %v3654_v36 = vld [vmem:[#allocation6 + $0x10] sm:$0xff]  ;;  %v244_v39 = vld [vmem:[#allocation11 + $0x2] sm:$0x3]  ;;  %v3710_v47 = vld [vmem:[#allocation9] ss:$0 sm:$0xff]  ;;  %p3413_p10 = por %p3412_p9, %p3411_p8 }
  0x5f   :  { %2828 = vmatprep.subr.mxu0 %v134_v8  ;;  %2839 = vmatprep.subr.mxu1 %v3469_v0  ;;  %v3668_v40 = vld [vmem:[#allocation6] sm:$0xff]  ;;  %v2645_v58 = vld [vmem:[%s4079_s8 + $0x2] sm:$0x3]  ;;  %s3472_s8 = smov 96  }
  0x60   :  { %2829 = vmatpush3.msra.mxu0 %v134_v8  ;;  %2840 = vmatpush3.msra.mxu1 %v3610_v9  ;;  %p3414_p11 = pnand %p3413_p10, %p3407_p7 }
  0x61   :  { %2831 = vmatmul.mubr.msk.f32.vlgmr.msra.gmra.mxu0 %vm160_vm1, %v153_v10  ;;  %2842 = vmatmul.mubr.msk.f32.vlgmr.msra.gmra.mxu1 %vm160_vm1, %v242_v11 }
  0x62   :  { %2844 = vmatprep.subr.mxu0 %v3469_v0  ;;  %2852 = vmatprep.mubr.msk.f32.mxu0 %vm3470_vm0, %v3469_v0 }
  0x63   :  { %2855 = vmatprep.subr.mxu1 %v3469_v0  ;;  %2863 = vmatprep.mubr.msk.f32.mxu1 %vm3470_vm0, %v3469_v0 }
  0x64   :  { %2845 = vmatpush3.msra.mxu0 %v3643_v32  ;;  %2856 = vmatpush3.msra.mxu1 %v3648_v34 }
  0x65   :  { %2846 = vmatprep.subr.mxu0 %v3469_v0  ;;  %2857 = vmatprep.subr.mxu1 %v3469_v0 }
  0x66   :  { %2847 = vmatpush3.msra.mxu0 %v3645_v33  ;;  %2858 = vmatpush3.msra.mxu1 %v3654_v36 }
  0x67   :  { %2848 = vmatprep.subr.mxu0 %v3469_v0  ;;  %2859 = vmatprep.subr.mxu1 %v3469_v0 }
  0x68   :  { %2849 = vmatpush3.msra.mxu0 %v3651_v35  ;;  %2860 = vmatpush3.msra.mxu1 %v3658_v37 }
  0x69   :  { %2850 = vmatprep.subr.mxu0 %v3469_v0  ;;  %2861 = vmatprep.subr.mxu1 %v3469_v0 }
  0x6a   :  { %2851 = vmatpush3.msra.mxu0 %v3661_v38  ;;  %2862 = vmatpush3.msra.mxu1 %v3668_v40 }
  0x6b   :  { %2853 = vmatmul.mubr.msk.f32.vlgmr.msra.gmra.mxu0 %vm160_vm1, %v244_v39  ;;  %2866 = vmatprep.subr.mxu0 %v3469_v0 }
  0x6c   :  { %2867 = vmatpush3.msra.mxu0 %v3590_v3  ;;  %2874 = vmatprep.mubr.msk.f32.mxu0 %vm3470_vm0, %v3469_v0 }
  0x6d   :  { %2868 = vmatprep.subr.mxu0 %v3469_v0  ;;  %2877 = vmatprep.subr.mxu1 %v3469_v0 }
  0x6e   :  { %2869 = vmatpush3.msra.mxu0 %v3593_v4 }
  0x6f   :  { %2870 = vmatprep.subr.mxu0 %v3469_v0 }
  0x70   :  { %2871 = vmatpush3.msra.mxu0 %v3603_v7 }
  0x71   :  { %2872 = vmatprep.subr.mxu0 %v3469_v0 }
  0x72   :  { %2873 = vmatpush3.msra.mxu0 %v3610_v9 }
  0x73   :  { %2888 = vmatprep.subr.mxu0 %v3469_v0 }
 0x121   :  { %v2832_v13 = vpop.f32.mrf.mxu0  ;;  %v317_v14 = vpop.f32.mrf.mxu1 }
 0x122   :  { %v3629_v15 = vadd.f32 %v2832_v13, %v2642_v12 }
 0x123   :  { %v233_v16 = vpop.f32.mrf.mxu0  ;;  %v2843_v17 = vpop.f32.mrf.mxu1 }
 0x124   :  { %v3631_v18 = vadd.f32 %v2642_v12, %v233_v16 }
 0x126   :  { %v321_v19 = vadd.f32 %v317_v14, %v3631_v18 }
 0x128   :  { %3125 = vtanh.f32 %v321_v19  ;;  %v2647_v22 = vmul.f32 -1.442695, %v321_v19 }
 0x12a   :  { %3127 = vpow2.f32 %v2647_v22 }
 0x12b   :  { %v419_v44 = vpop.f32.mrf.mxu0 }
 0x12d   :  { %v2854_v45 = vpop.f32.mrf.mxu0 }
 0x135   :  { %v3126_v20 = vpop.eup %3125 }
 0x136   :  { %335 = vrot.lane.b32.xlu0 %v3126_v20, %s3471_s19 }
 0x137   :  { %v3128_v23 = vpop.eup %3127 }
 0x138   :  { %v325_v24 = vadd.f32 1.0, %v3128_v23 }
 0x13a   :  { %330 = vrot.lane.b32.xlu0 %v245_v21, %s3466_s20  ;;  %3129 = vrcp.f32 %v325_v24 }
 0x147   :  { %v3130_v25 = vpop.eup %3129 }
 0x1a8   :  { %v336_v26 = vpop.permute.xlu0 %335 }
 0x1a9   :  { %v338_v27 = vmul.f32 %v3130_v25, %v336_v26 }
 0x1ab   :  { %340 = vrot.lane.b32.xlu1 %v338_v27, %s3466_s20 }
 0x1ac   :  { %v331_v28 = vpop.permute.xlu0 %330 }
 0x1ad   :  { %v333_v29 = vmul.f32 %v3130_v25, %v331_v28 }
 0x21d   :  { %v341_v30 = vpop.permute.xlu1 %340 }
 0x21e   :  { %v3640_v31 = vadd.f32 %v341_v30, %v333_v29 }
 0x220   :  { %3131 = vtanh.f32 %v3640_v31  ;;  %v621_v13 = vrot.slane %v3640_v31, 6 }
 0x22d   :  { %v3132_v41 = vpop.eup %3131 }
 0x22e   :  { %346 = vrot.lane.b32.xlu1 %v3132_v41, %s3471_s19 }
 0x2a0   :  { %v347_v42 = vpop.permute.xlu1 %346 }
 0x2a1   :  { %v349_v43 = vmul.f32 %v3130_v25, %v347_v42 }
 0x2a3   :  { %424 = vrot.lane.b32.xlu0 %v349_v43, %s3466_s20 }
 0x315   :  { %v425_v46 = vpop.permute.xlu0 %424 }
 0x316   :  { %2864 = vmatmul.mubr.msk.f32.vlgmr.msra.gmra.mxu1 %vm160_vm1, %v425_v46  ;;  %2875 = vmatmul.mubr.msk.f32.vlgmr.msra.gmra.mxu0 %vm160_vm1, %v425_v46 }
 0x317   :  { %2878 = vmatpush3.msra.mxu1 %v3643_v32  ;;  %2889 = vmatpush3.msra.mxu0 %v3648_v34 }
 0x318   :  { %2879 = vmatprep.subr.mxu1 %v3469_v0  ;;  %2890 = vmatprep.subr.mxu0 %v3469_v0 }
 0x319   :  { %2880 = vmatpush3.msra.mxu1 %v3645_v33  ;;  %2891 = vmatpush3.msra.mxu0 %v3654_v36 }
 0x31a   :  { %2881 = vmatprep.subr.mxu1 %v3469_v0  ;;  %2892 = vmatprep.subr.mxu0 %v3469_v0 }
 0x31b   :  { %2882 = vmatpush3.msra.mxu1 %v3651_v35  ;;  %2885 = vmatprep.mubr.msk.f32.mxu1 %vm3470_vm0, %v3469_v0 }
 0x31c   :  { %2883 = vmatprep.subr.mxu1 %v3469_v0  ;;  %2893 = vmatpush3.msra.mxu0 %v3658_v37 }
 0x31d   :  { %2884 = vmatpush3.msra.mxu1 %v3661_v38  ;;  %2894 = vmatprep.subr.mxu0 %v3469_v0 }
 0x31e   :  { %2899 = vmatprep.subr.mxu1 %v3469_v0  ;;  %2895 = vmatpush3.msra.mxu0 %v3668_v40 }
 0x31f   :  { %2896 = vmatprep.mubr.msk.f32.mxu0 %vm3470_vm0, %v3469_v0  ;;  %2910 = vmatprep.subr.mxu0 %v3469_v0 }
 0x3d6   :  { %v494_v48 = vpop.f32.mrf.mxu1  ;;  %v605_v49 = vpop.f32.mrf.mxu0 }
 0x3d7   :  { %v495_v50 = vadd.f32 %v494_v48, %v419_v44  ;;  %v610_v51 = vrot.slane %v605_v49, 6 }
 0x3d8   :  { %v2865_v52 = vpop.f32.mrf.mxu1  ;;  %v2876_v53 = vpop.f32.mrf.mxu0 }
 0x3d9   :  { %v504_v54 = vadd.f32 %v3710_v47, %v495_v50  ;;  %v612_v55 = vadd.f32 %v610_v51, %v3631_v18 }
 0x3db   :  { %3133 = vtanh.f32 %v504_v54  ;;  %v2651_v59 = vmul.f32 -1.442695, %v504_v54  ;;  %v2653_v60 = vmul.f32 -1.442695, %v612_v55 }
 0x3dc   :  { %3135 = vtanh.f32 %v612_v55 }
 0x3dd   :  { %3137 = vpow2.f32 %v2651_v59 }
 0x3de   :  { %3139 = vpow2.f32 %v2653_v60 }
 0x3e8   :  { %v3134_v56 = vpop.eup %3133 }
 0x3e9   :  { %v3136_v57 = vpop.eup %3135  ;;  %518 = vrot.lane.b32.xlu1 %v3134_v56, %s3471_s19 }
 0x3ea   :  { %625 = vrot.lane.b32.xlu0 %v3136_v57, %s3471_s19  ;;  %v3138_v61 = vpop.eup %3137 }
 0x3eb   :  { %v3140_v62 = vpop.eup %3139  ;;  %v508_v63 = vadd.f32 1.0, %v3138_v61 }
 0x3ec   :  { %v616_v1 = vadd.f32 1.0, %v3140_v62 }
 0x3ed   :  { %513 = vrot.lane.b32.xlu1 %v2645_v58, %s3466_s20  ;;  %3141 = vrcp.f32 %v508_v63 }
 0x3ee   :  { %3143 = vrcp.f32 %v616_v1 }
 0x3fa   :  { %v3142_v2 = vpop.eup %3141 }
 0x3fb   :  { %v3144_v6 = vpop.eup %3143 }
 0x3fc   :  { %v623_v16 = vmul.f32 %v3144_v6, %v621_v13 }
 0x45b   :  { %v519_v5 = vpop.permute.xlu1 %518 }
 0x45c   :  { %v626_v8 = vpop.permute.xlu0 %625  ;;  %v521_v10 = vmul.f32 %v3142_v2, %v519_v5 }
 0x45d   :  { %v628_v11 = vmul.f32 %v3144_v6, %v626_v8 }
 0x45e   :  { %523 = vrot.lane.b32.xlu0 %v521_v10, %s3466_s20 }
 0x45f   :  { %630 = vrot.lane.b32.xlu1 %v628_v11, %s3466_s20  ;;  %v514_v12 = vpop.permute.xlu1 %513 }
 0x460   :  { %v516_v14 = vmul.f32 %v3142_v2, %v514_v12 }
 0x4d0   :  { %v524_v17 = vpop.permute.xlu0 %523 }
 0x4d1   :  { %v631_v19 = vpop.permute.xlu1 %630  ;;  %v3723_v20 = vadd.f32 %v524_v17, %v516_v14 }
 0x4d2   :  { %v3725_v21 = vadd.f32 %v631_v19, %v623_v16 }
 0x4d3   :  { %3145 = vtanh.f32 %v3723_v20 }
 0x4d4   :  { %3147 = vtanh.f32 %v3725_v21 }
 0x4e0   :  { %v3146_v22 = vpop.eup %3145 }
 0x4e1   :  { %v3148_v23 = vpop.eup %3147  ;;  %529 = vrot.lane.b32.xlu0 %v3146_v22, %s3471_s19 }
 0x4e2   :  { %636 = vrot.lane.b32.xlu1 %v3148_v23, %s3471_s19 }
 0x553   :  { %v530_v24 = vpop.permute.xlu0 %529 }
 0x554   :  { %v637_v25 = vpop.permute.xlu1 %636  ;;  %v532_v26 = vmul.f32 %v3142_v2, %v530_v24 }
 0x555   :  { %v639_v27 = vmul.f32 %v3144_v6, %v637_v25  ;;  %v900_v6 = vrot.slane %v3725_v21, 6 }
 0x556   :  { %534 = vrot.lane.b32.xlu0 %v532_v26, %s3466_s20 }
 0x557   :  { %v713_v28 = vrot.slane %v639_v27, 2 }
 0x559   :  { %714 = vrot.lane.b32.xlu1 %v713_v28, %s3466_s20 }
 0x5c8   :  { %v535_v29 = vpop.permute.xlu0 %534 }
 0x5c9   :  { %538 = vst.msk [vmem:[#allocation2] sm:$0x3] %vm537_vm2, %v535_v29  ;;  %2886 = vmatmul.mubr.msk.f32.vlgmr.msra.gmra.mxu1 %vm160_vm1, %v535_v29 }
 0x5ca   :  { %2900 = vmatpush3.msra.mxu1 %v3590_v3  ;;  %2907 = vmatprep.mubr.msk.f32.mxu1 %vm3470_vm0, %v3469_v0 }
 0x5cb   :  { %v715_v30 = vpop.permute.xlu1 %714  ;;  %2901 = vmatprep.subr.mxu1 %v3469_v0 }
 0x5cc   :  { %2897 = vmatmul.mubr.msk.f32.vlgmr.msra.gmra.mxu0 %vm160_vm1, %v715_v30  ;;  %2902 = vmatpush3.msra.mxu1 %v3593_v4 }
 0x5cd   :  { %2903 = vmatprep.subr.mxu1 %v3469_v0  ;;  %2911 = vmatpush3.msra.mxu0 %v3643_v32 }
 0x5ce   :  { %2904 = vmatpush3.msra.mxu1 %v3603_v7  ;;  %2912 = vmatprep.subr.mxu0 %v3469_v0 }
 0x5cf   :  { %2905 = vmatprep.subr.mxu1 %v3469_v0  ;;  %2913 = vmatpush3.msra.mxu0 %v3645_v33 }
 0x5d0   :  { %2906 = vmatpush3.msra.mxu1 %v3610_v9  ;;  %2914 = vmatprep.subr.mxu0 %v3469_v0 }
 0x5d1   :  { %2908 = vmatmul.mubr.msk.f32.vlgmr.msra.gmra.mxu1 %vm160_vm1, %v715_v30  ;;  %2915 = vmatpush3.msra.mxu0 %v3651_v35 }
 0x5d2   :  { %2916 = vmatprep.subr.mxu0 %v3469_v0  ;;  %2918 = vmatprep.mubr.msk.f32.mxu0 %vm3470_vm0, %v3469_v0 }
 0x5d3   :  { %2917 = vmatpush3.msra.mxu0 %v3661_v38  ;;  %2921 = vmatprep.subr.mxu1 %v3469_v0 }
 0x5d4   :  { %2932 = vmatprep.subr.mxu0 %v3469_v0  ;;  %2922 = vmatpush3.msra.mxu1 %v3648_v34 }
 0x5d5   :  { %2923 = vmatprep.subr.mxu1 %v3469_v0  ;;  %2929 = vmatprep.mubr.msk.f32.mxu1 %vm3470_vm0, %v3469_v0 }
 0x5d6   :  { %2924 = vmatpush3.msra.mxu1 %v3654_v36 }
 0x5d7   :  { %2925 = vmatprep.subr.mxu1 %v3469_v0 }
 0x5d8   :  { %2926 = vmatpush3.msra.mxu1 %v3658_v37 }
 0x5d9   :  { %2927 = vmatprep.subr.mxu1 %v3469_v0 }
 0x5da   :  { %2928 = vmatpush3.msra.mxu1 %v3668_v40 }
 0x5db   :  { %2943 = vmatprep.subr.mxu1 %v3469_v0 }
 0x689   :  { %v708_v31 = vpop.f32.mrf.mxu1 }
 0x68b   :  { %v2887_v39 = vpop.f32.mrf.mxu1 }
 0x68c   :  { %v784_v41 = vpop.f32.mrf.mxu0 }
 0x68d   :  { %v785_v42 = vadd.f32 %v784_v41, %v708_v31 }
 0x68e   :  { %v2898_v43 = vpop.f32.mrf.mxu0 }
 0x68f   :  { %v788_v44 = vadd.f32 %v3710_v47, %v785_v42 }
 0x691   :  { %3149 = vtanh.f32 %v788_v44  ;;  %v884_v45 = vpop.f32.mrf.mxu1  ;;  %v2656_v52 = vmul.f32 -1.442695, %v788_v44 }
 0x692   :  { %v889_v46 = vrot.slane %v884_v45, 4 }
 0x693   :  { %v2909_v48 = vpop.f32.mrf.mxu1 }
 0x694   :  { %v891_v49 = vadd.f32 %v889_v46, %v3631_v18 }
 0x696   :  { %3151 = vtanh.f32 %v891_v49  ;;  %v2658_v53 = vmul.f32 -1.442695, %v891_v49 }
 0x697   :  { %3153 = vpow2.f32 %v2656_v52 }
 0x698   :  { %3155 = vpow2.f32 %v2658_v53 }
 0x69e   :  { %v3150_v50 = vpop.eup %3149 }
 0x69f   :  { %798 = vrot.lane.b32.xlu0 %v3150_v50, %s3471_s19 }
 0x6a3   :  { %v3152_v51 = vpop.eup %3151 }
 0x6a4   :  { %904 = vrot.lane.b32.xlu1 %v3152_v51, %s3471_s19  ;;  %v3154_v54 = vpop.eup %3153 }
 0x6a5   :  { %v792_v55 = vadd.f32 1.0, %v3154_v54  ;;  %v3156_v56 = vpop.eup %3155 }
 0x6a6   :  { %v895_v57 = vadd.f32 1.0, %v3156_v56 }
 0x6a7   :  { %3157 = vrcp.f32 %v792_v55 }
 0x6a8   :  { %3159 = vrcp.f32 %v895_v57 }
 0x6b4   :  { %v3158_v58 = vpop.eup %3157 }
 0x6b5   :  { %v3160_v61 = vpop.eup %3159  ;;  %v796_v1 = vmul.f32 %v3158_v58, %v3723_v20 }
 0x6b6   :  { %v902_v8 = vmul.f32 %v3160_v61, %v900_v6 }
 0x711   :  { %v799_v59 = vpop.permute.xlu0 %798 }
 0x712   :  { %v801_v60 = vmul.f32 %v3158_v58, %v799_v59 }
 0x714   :  { %803 = vrot.lane.b32.xlu0 %v801_v60, %s3466_s20 }
 0x716   :  { %v905_v62 = vpop.permute.xlu1 %904 }
 0x717   :  { %v907_v63 = vmul.f32 %v3160_v61, %v905_v62 }
 0x719   :  { %909 = vrot.lane.b32.xlu1 %v907_v63, %s3466_s20 }
 0x786   :  { %v804_v2 = vpop.permute.xlu0 %803 }
 0x787   :  { %v3774_v5 = vadd.f32 %v804_v2, %v796_v1 }
 0x789   :  { %3161 = vtanh.f32 %v3774_v5 }
 0x78b   :  { %v910_v10 = vpop.permute.xlu1 %909 }
 0x78c   :  { %v3778_v11 = vadd.f32 %v910_v10, %v902_v8 }
 0x78e   :  { %3163 = vtanh.f32 %v3778_v11  ;;  %v1179_v55 = vrot.slane %v3778_v11, 6 }
 0x796   :  { %v3162_v12 = vpop.eup %3161 }
 0x797   :  { %809 = vrot.lane.b32.xlu0 %v3162_v12, %s3471_s19 }
 0x79b   :  { %v3164_v13 = vpop.eup %3163 }
 0x79c   :  { %915 = vrot.lane.b32.xlu1 %v3164_v13, %s3471_s19 }
 0x809   :  { %v810_v14 = vpop.permute.xlu0 %809 }
 0x80a   :  { %v812_v16 = vmul.f32 %v3158_v58, %v810_v14 }
 0x80c   :  { %814 = vrot.lane.b32.xlu0 %v812_v16, %s3466_s20 }
 0x80e   :  { %v916_v17 = vpop.permute.xlu1 %915 }
 0x80f   :  { %v918_v19 = vmul.f32 %v3160_v61, %v916_v17 }
 0x811   :  { %v992_v20 = vrot.slane %v918_v19, 4 }
 0x813   :  { %993 = vrot.lane.b32.xlu1 %v992_v20, %s3466_s20 }
 0x87e   :  { %v815_v21 = vpop.permute.xlu0 %814 }
 0x87f   :  { %817 = vst.msk [vmem:[#allocation2 + $0x2] sm:$0x3] %vm537_vm2, %v815_v21  ;;  %2919 = vmatmul.mubr.msk.f32.vlgmr.msra.gmra.mxu0 %vm160_vm1, %v815_v21 }
 0x880   :  { %2933 = vmatpush3.msra.mxu0 %v3590_v3  ;;  %2940 = vmatprep.mubr.msk.f32.mxu0 %vm3470_vm0, %v3469_v0 }
 0x881   :  { %2934 = vmatprep.subr.mxu0 %v3469_v0 }
 0x882   :  { %2935 = vmatpush3.msra.mxu0 %v3593_v4 }
 0x883   :  { %2936 = vmatprep.subr.mxu0 %v3469_v0 }
 0x884   :  { %2937 = vmatpush3.msra.mxu0 %v3603_v7 }
 0x885   :  { %2938 = vmatprep.subr.mxu0 %v3469_v0  ;;  %v994_v22 = vpop.permute.xlu1 %993 }
 0x886   :  { %2939 = vmatpush3.msra.mxu0 %v3610_v9  ;;  %2930 = vmatmul.mubr.msk.f32.vlgmr.msra.gmra.mxu1 %vm160_vm1, %v994_v22 }
 0x887   :  { %2941 = vmatmul.mubr.msk.f32.vlgmr.msra.gmra.mxu0 %vm160_vm1, %v994_v22  ;;  %2944 = vmatpush3.msra.mxu1 %v3643_v32 }
 0x888   :  { %2945 = vmatprep.subr.mxu1 %v3469_v0  ;;  %2954 = vmatprep.subr.mxu0 %v3469_v0 }
 0x889   :  { %2946 = vmatpush3.msra.mxu1 %v3645_v33  ;;  %2955 = vmatpush3.msra.mxu0 %v3648_v34 }
 0x88a   :  { %2947 = vmatprep.subr.mxu1 %v3469_v0  ;;  %2956 = vmatprep.subr.mxu0 %v3469_v0 }
 0x88b   :  { %2948 = vmatpush3.msra.mxu1 %v3651_v35  ;;  %2957 = vmatpush3.msra.mxu0 %v3654_v36 }
 0x88c   :  { %2949 = vmatprep.subr.mxu1 %v3469_v0  ;;  %2958 = vmatprep.subr.mxu0 %v3469_v0 }
 0x88d   :  { %2950 = vmatpush3.msra.mxu1 %v3661_v38  ;;  %2951 = vmatprep.mubr.msk.f32.mxu1 %vm3470_vm0, %v3469_v0 }
 0x88e   :  { %2959 = vmatpush3.msra.mxu0 %v3658_v37  ;;  %2965 = vmatprep.subr.mxu1 %v3469_v0 }
 0x88f   :  { %2960 = vmatprep.subr.mxu0 %v3469_v0  ;;  %2962 = vmatprep.mubr.msk.f32.mxu0 %vm3470_vm0, %v3469_v0 }
 0x890   :  { %2961 = vmatpush3.msra.mxu0 %v3668_v40 }
 0x891   :  { %2976 = vmatprep.subr.mxu0 %v3469_v0 }
 0x93f   :  { %v987_v23 = vpop.f32.mrf.mxu0 }
 0x941   :  { %v2920_v24 = vpop.f32.mrf.mxu0 }
 0x946   :  { %v1063_v25 = vpop.f32.mrf.mxu1 }
 0x947   :  { %v1064_v26 = vadd.f32 %v1063_v25, %v987_v23  ;;  %v1163_v27 = vpop.f32.mrf.mxu0 }
 0x948   :  { %v1168_v28 = vrot.slane %v1163_v27, 2  ;;  %v2931_v29 = vpop.f32.mrf.mxu1 }
 0x949   :  { %v1067_v30 = vadd.f32 %v3710_v47, %v1064_v26  ;;  %v2942_v31 = vpop.f32.mrf.mxu0 }
 0x94a   :  { %v1170_v39 = vadd.f32 %v1168_v28, %v3631_v18 }
 0x94b   :  { %3165 = vtanh.f32 %v1067_v30  ;;  %v2661_v43 = vmul.f32 -1.442695, %v1067_v30 }
 0x94c   :  { %3167 = vtanh.f32 %v1170_v39  ;;  %v2663_v44 = vmul.f32 -1.442695, %v1170_v39 }
 0x94d   :  { %3169 = vpow2.f32 %v2661_v43 }
 0x94e   :  { %3171 = vpow2.f32 %v2663_v44 }
 0x958   :  { %v3166_v41 = vpop.eup %3165 }
 0x959   :  { %v3168_v42 = vpop.eup %3167  ;;  %1077 = vrot.lane.b32.xlu1 %v3166_v41, %s3471_s19 }
 0x95a   :  { %1183 = vrot.lane.b32.xlu0 %v3168_v42, %s3471_s19  ;;  %v3170_v45 = vpop.eup %3169 }
 0x95b   :  { %v3172_v46 = vpop.eup %3171  ;;  %v1071_v48 = vadd.f32 1.0, %v3170_v45 }
 0x95c   :  { %v1174_v49 = vadd.f32 1.0, %v3172_v46 }
 0x95d   :  { %3173 = vrcp.f32 %v1071_v48 }
 0x95e   :  { %3175 = vrcp.f32 %v1174_v49 }
 0x96a   :  { %v3174_v50 = vpop.eup %3173 }
 0x96b   :  { %v3176_v51 = vpop.eup %3175  ;;  %v1075_v56 = vmul.f32 %v3174_v50, %v3774_v5 }
 0x96c   :  { %v1181_v57 = vmul.f32 %v3176_v51, %v1179_v55 }
 0x9cb   :  { %v1078_v18 = vpop.permute.xlu1 %1077 }
 0x9cc   :  { %v1184_v52 = vpop.permute.xlu0 %1183  ;;  %v1080_v53 = vmul.f32 %v3174_v50, %v1078_v18 }
 0x9cd   :  { %v1186_v54 = vmul.f32 %v3176_v51, %v1184_v52 }
 0x9ce   :  { %1082 = vrot.lane.b32.xlu1 %v1080_v53, %s3466_s20 }
 0x9cf   :  { %1188 = vrot.lane.b32.xlu0 %v1186_v54, %s3466_s20 }
 0xa40   :  { %v1083_v58 = vpop.permute.xlu1 %1082 }
 0xa41   :  { %v1189_v59 = vpop.permute.xlu0 %1188  ;;  %v3827_v60 = vadd.f32 %v1083_v58, %v1075_v56 }
 0xa42   :  { %v3829_v61 = vadd.f32 %v1189_v59, %v1181_v57 }
 0xa43   :  { %3177 = vtanh.f32 %v3827_v60 }
 0xa44   :  { %3179 = vtanh.f32 %v3829_v61  ;;  %v1455_v46 = vrot.slane %v3829_v61, 6 }
 0xa50   :  { %v3178_v62 = vpop.eup %3177 }
 0xa51   :  { %v3180_v63 = vpop.eup %3179  ;;  %1088 = vrot.lane.b32.xlu1 %v3178_v62, %s3471_s19 }
 0xa52   :  { %1194 = vrot.lane.b32.xlu0 %v3180_v63, %s3471_s19 }
 0xac3   :  { %v1089_v1 = vpop.permute.xlu1 %1088 }
 0xac4   :  { %v1195_v2 = vpop.permute.xlu0 %1194  ;;  %v1091_v5 = vmul.f32 %v3174_v50, %v1089_v1 }
 0xac5   :  { %v1197_v6 = vmul.f32 %v3176_v51, %v1195_v2 }
 0xac6   :  { %1093 = vrot.lane.b32.xlu0 %v1091_v5, %s3466_s20 }
 0xac7   :  { %v1271_v8 = vrot.slane %v1197_v6, 6 }
 0xac9   :  { %1272 = vrot.lane.b32.xlu1 %v1271_v8, %s3466_s20 }
 0xb38   :  { %v1094_v10 = vpop.permute.xlu0 %1093 }
 0xb39   :  { %1096 = vst.msk [vmem:[#allocation2 + $0x4] sm:$0x3] %vm537_vm2, %v1094_v10  ;;  %2952 = vmatmul.mubr.msk.f32.vlgmr.msra.gmra.mxu1 %vm160_vm1, %v1094_v10 }
 0xb3a   :  { %2966 = vmatpush3.msra.mxu1 %v3590_v3  ;;  %2973 = vmatprep.mubr.msk.f32.mxu1 %vm3470_vm0, %v3469_v0 }
 0xb3b   :  { %2967 = vmatprep.subr.mxu1 %v3469_v0  ;;  %v1273_v11 = vpop.permute.xlu1 %1272 }
 0xb3c   :  { %2963 = vmatmul.mubr.msk.f32.vlgmr.msra.gmra.mxu0 %vm160_vm1, %v1273_v11  ;;  %2968 = vmatpush3.msra.mxu1 %v3593_v4 }
 0xb3d   :  { %2969 = vmatprep.subr.mxu1 %v3469_v0  ;;  %2977 = vmatpush3.msra.mxu0 %v3643_v32 }
 0xb3e   :  { %2970 = vmatpush3.msra.mxu1 %v3603_v7  ;;  %2978 = vmatprep.subr.mxu0 %v3469_v0 }
 0xb3f   :  { %2971 = vmatprep.subr.mxu1 %v3469_v0  ;;  %2979 = vmatpush3.msra.mxu0 %v3645_v33 }
 0xb40   :  { %2972 = vmatpush3.msra.mxu1 %v3610_v9  ;;  %2980 = vmatprep.subr.mxu0 %v3469_v0 }
 0xb41   :  { %2974 = vmatmul.mubr.msk.f32.vlgmr.msra.gmra.mxu1 %vm160_vm1, %v1273_v11  ;;  %2987 = vmatprep.subr.mxu1 %v3469_v0 }
 0xb42   :  { %2981 = vmatpush3.msra.mxu0 %v3651_v35  ;;  %2988 = vmatpush3.msra.mxu1 %v3648_v34 }
 0xb43   :  { %2982 = vmatprep.subr.mxu0 %v3469_v0  ;;  %2989 = vmatprep.subr.mxu1 %v3469_v0 }
 0xb44   :  { %2983 = vmatpush3.msra.mxu0 %v3661_v38  ;;  %2990 = vmatpush3.msra.mxu1 %v3654_v36 }
 0xb45   :  { %2984 = vmatprep.mubr.msk.f32.mxu0 %vm3470_vm0, %v3469_v0  ;;  %2991 = vmatprep.subr.mxu1 %v3469_v0 }
 0xb46   :  { %2998 = vmatprep.subr.mxu0 %v3469_v0  ;;  %2992 = vmatpush3.msra.mxu1 %v3658_v37 }
 0xb47   :  { %2993 = vmatprep.subr.mxu1 %v3469_v0  ;;  %2995 = vmatprep.mubr.msk.f32.mxu1 %vm3470_vm0, %v3469_v0 }
 0xb48   :  { %2994 = vmatpush3.msra.mxu1 %v3668_v40 }
 0xb49   :  { %3009 = vmatprep.subr.mxu1 %v3469_v0 }
 0xbf9   :  { %v1266_v12 = vpop.f32.mrf.mxu1 }
 0xbfb   :  { %v2953_v13 = vpop.f32.mrf.mxu1 }
 0xbfc   :  { %v1342_v14 = vpop.f32.mrf.mxu0 }
 0xbfd   :  { %v1343_v16 = vadd.f32 %v1342_v14, %v1266_v12 }
 0xbfe   :  { %v2964_v17 = vpop.f32.mrf.mxu0 }
 0xbff   :  { %v1346_v19 = vadd.f32 %v3710_v47, %v1343_v16 }
 0xc01   :  { %3181 = vtanh.f32 %v1346_v19  ;;  %v1442_v20 = vpop.f32.mrf.mxu1  ;;  %v2666_v25 = vmul.f32 -1.442695, %v1346_v19 }
 0xc02   :  { %v1446_v21 = vadd.f32 %v1442_v20, %v3629_v15 }
 0xc03   :  { %v2975_v22 = vpop.f32.mrf.mxu1 }
 0xc04   :  { %3183 = vtanh.f32 %v1446_v21  ;;  %v2668_v26 = vmul.f32 -1.442695, %v1446_v21 }
 0xc05   :  { %3185 = vpow2.f32 %v2666_v25 }
 0xc06   :  { %3187 = vpow2.f32 %v2668_v26 }
 0xc0e   :  { %v3182_v23 = vpop.eup %3181 }
 0xc0f   :  { %1356 = vrot.lane.b32.xlu0 %v3182_v23, %s3471_s19 }
 0xc11   :  { %v3184_v24 = vpop.eup %3183 }
 0xc12   :  { %1459 = vrot.lane.b32.xlu1 %v3184_v24, %s3471_s19  ;;  %v3186_v27 = vpop.eup %3185 }
 0xc13   :  { %v3188_v28 = vpop.eup %3187  ;;  %v1350_v29 = vadd.f32 1.0, %v3186_v27 }
 0xc14   :  { %v1450_v30 = vadd.f32 1.0, %v3188_v28 }
 0xc15   :  { %3189 = vrcp.f32 %v1350_v29 }
 0xc16   :  { %3191 = vrcp.f32 %v1450_v30 }
 0xc22   :  { %v3190_v31 = vpop.eup %3189 }
 0xc23   :  { %v3192_v42 = vpop.eup %3191  ;;  %v1354_v45 = vmul.f32 %v3190_v31, %v3827_v60 }
 0xc24   :  { %v1457_v50 = vmul.f32 %v3192_v42, %v1455_v46  ;;  %v3943_v46 = vld [vmem:[#allocation3 + $0x18] sm:$0xff] }
 0xc81   :  { %v1357_v39 = vpop.permute.xlu0 %1356 }
 0xc82   :  { %v1359_v41 = vmul.f32 %v3190_v31, %v1357_v39 }
 0xc84   :  { %1361 = vrot.lane.b32.xlu0 %v1359_v41, %s3466_s20  ;;  %v1460_v43 = vpop.permute.xlu1 %1459 }
 0xc85   :  { %v1462_v44 = vmul.f32 %v3192_v42, %v1460_v43 }
 0xc87   :  { %1464 = vrot.lane.b32.xlu1 %v1462_v44, %s3466_s20 }
 0xcf6   :  { %v1362_v48 = vpop.permute.xlu0 %1361 }
 0xcf7   :  { %v3879_v49 = vadd.f32 %v1362_v48, %v1354_v45  ;;  %v3949_v48 = vld [vmem:[#allocation3 + $0x10] sm:$0xff] }
 0xcf9   :  { %3193 = vtanh.f32 %v3879_v49  ;;  %v1465_v18 = vpop.permute.xlu1 %1464 }
 0xcfa   :  { %v3882_v51 = vadd.f32 %v1465_v18, %v1457_v50  ;;  %v3958_v18 = vld [vmem:[#allocation3] sm:$0xff] }
 0xcfc   :  { %3195 = vtanh.f32 %v3882_v51  ;;  %v1733_v26 = vrot.slane %v3882_v51, 6 }
 0xd06   :  { %v3194_v52 = vpop.eup %3193 }
 0xd07   :  { %1367 = vrot.lane.b32.xlu0 %v3194_v52, %s3471_s19 }
 0xd09   :  { %v3196_v53 = vpop.eup %3195 }
 0xd0a   :  { %1470 = vrot.lane.b32.xlu1 %v3196_v53, %s3471_s19 }
 0xd79   :  { %v1368_v54 = vpop.permute.xlu0 %1367 }
 0xd7a   :  { %v1370_v55 = vmul.f32 %v3190_v31, %v1368_v54 }
 0xd7c   :  { %1372 = vrot.lane.b32.xlu0 %v1370_v55, %s3466_s20  ;;  %v1471_v56 = vpop.permute.xlu1 %1470 }
 0xd7d   :  { %v1473_v57 = vmul.f32 %v3192_v42, %v1471_v56 }
 0xd7f   :  { %1547 = vrot.lane.b32.xlu1 %v1473_v57, %s3466_s20 }
 0xdee   :  { %v1373_v58 = vpop.permute.xlu0 %1372 }
 0xdef   :  { %1375 = vst.msk [vmem:[#allocation2 + $0x6] sm:$0x3] %vm537_vm2, %v1373_v58  ;;  %2985 = vmatmul.mubr.msk.f32.vlgmr.msra.gmra.mxu0 %vm160_vm1, %v1373_v58 }
 0xdf0   :  { %2999 = vmatpush3.msra.mxu0 %v3590_v3  ;;  %3006 = vmatprep.mubr.msk.f32.mxu0 %vm3470_vm0, %v3469_v0 }
 0xdf1   :  { %3000 = vmatprep.subr.mxu0 %v3469_v0  ;;  %v1548_v59 = vpop.permute.xlu1 %1547 }
 0xdf2   :  { %3001 = vmatpush3.msra.mxu0 %v3593_v4  ;;  %2996 = vmatmul.mubr.msk.f32.vlgmr.msra.gmra.mxu1 %vm160_vm1, %v1548_v59 }
 0xdf3   :  { %3002 = vmatprep.subr.mxu0 %v3469_v0  ;;  %3010 = vmatpush3.msra.mxu1 %v3643_v32 }
 0xdf4   :  { %3003 = vmatpush3.msra.mxu0 %v3603_v7  ;;  %3011 = vmatprep.subr.mxu1 %v3469_v0 }
 0xdf5   :  { %3004 = vmatprep.subr.mxu0 %v3469_v0  ;;  %3012 = vmatpush3.msra.mxu1 %v3645_v33 }
 0xdf6   :  { %3005 = vmatpush3.msra.mxu0 %v3610_v9  ;;  %3013 = vmatprep.subr.mxu1 %v3469_v0 }
 0xdf7   :  { %3007 = vmatmul.mubr.msk.f32.vlgmr.msra.gmra.mxu0 %vm160_vm1, %v1548_v59  ;;  %3014 = vmatpush3.msra.mxu1 %v3651_v35 }
 0xdf8   :  { %3015 = vmatprep.subr.mxu1 %v3469_v0  ;;  %3020 = vmatprep.subr.mxu0 %v3469_v0 }
 0xdf9   :  { %3016 = vmatpush3.msra.mxu1 %v3661_v38  ;;  %3017 = vmatprep.mubr.msk.f32.mxu1 %vm3470_vm0, %v3469_v0 }
 0xdfa   :  { %3021 = vmatpush3.msra.mxu0 %v3648_v34  ;;  %3031 = vmatprep.subr.mxu1 %v3469_v0 }
 0xdfb   :  { %3022 = vmatprep.subr.mxu0 %v3469_v0  ;;  %3028 = vmatprep.mubr.msk.f32.mxu0 %vm3470_vm0, %v3469_v0 }
 0xdfc   :  { %3023 = vmatpush3.msra.mxu0 %v3654_v36 }
 0xdfd   :  { %3024 = vmatprep.subr.mxu0 %v3469_v0 }
 0xdfe   :  { %3025 = vmatpush3.msra.mxu0 %v3658_v37 }
 0xdff   :  { %3026 = vmatprep.subr.mxu0 %v3469_v0 }
 0xe00   :  { %3027 = vmatpush3.msra.mxu0 %v3668_v40 }
 0xe01   :  { %3042 = vmatprep.subr.mxu0 %v3469_v0 }
 0xeaf   :  { %v1542_v3 = vpop.f32.mrf.mxu0 }
 0xeb1   :  { %v2986_v4 = vpop.f32.mrf.mxu0 }
 0xeb2   :  { %v1617_v7 = vpop.f32.mrf.mxu1 }
 0xeb3   :  { %v1618_v9 = vadd.f32 %v1617_v7, %v1542_v3 }
 0xeb4   :  { %v2997_v60 = vpop.f32.mrf.mxu1 }
 0xeb5   :  { %v1621_v61 = vadd.f32 %v3710_v47, %v1618_v9 }
 0xeb7   :  { %3197 = vtanh.f32 %v1621_v61  ;;  %v1717_v62 = vpop.f32.mrf.mxu0  ;;  %v2671_v8 = vmul.f32 -1.442695, %v1621_v61 }
 0xeb8   :  { %v1722_v63 = vrot.slane %v1717_v62, 6 }
 0xeb9   :  { %v3008_v1 = vpop.f32.mrf.mxu0 }
 0xeba   :  { %v1724_v2 = vadd.f32 %v1722_v63, %v3629_v15 }
 0xebc   :  { %3199 = vtanh.f32 %v1724_v2  ;;  %v2673_v10 = vmul.f32 -1.442695, %v1724_v2 }
 0xebd   :  { %3201 = vpow2.f32 %v2671_v8 }
 0xebe   :  { %3203 = vpow2.f32 %v2673_v10 }
 0xec4   :  { %v3198_v5 = vpop.eup %3197 }
 0xec5   :  { %1631 = vrot.lane.b32.xlu0 %v3198_v5, %s3471_s19 }
 0xec9   :  { %v3200_v6 = vpop.eup %3199 }
 0xeca   :  { %1737 = vrot.lane.b32.xlu1 %v3200_v6, %s3471_s19  ;;  %v3202_v11 = vpop.eup %3201 }
 0xecb   :  { %v1625_v12 = vadd.f32 1.0, %v3202_v11  ;;  %v3204_v13 = vpop.eup %3203 }
 0xecc   :  { %v1728_v14 = vadd.f32 1.0, %v3204_v13 }
 0xecd   :  { %3205 = vrcp.f32 %v1625_v12 }
 0xece   :  { %3207 = vrcp.f32 %v1728_v14 }
 0xeda   :  { %v3206_v16 = vpop.eup %3205 }
 0xedb   :  { %v3208_v20 = vpop.eup %3207  ;;  %v1629_v23 = vmul.f32 %v3206_v16, %v3879_v49  ;;  %v3953_v49 = vld [vmem:[#allocation3 + $0x8] sm:$0xff] }
 0xedc   :  { %v1735_v27 = vmul.f32 %v3208_v20, %v1733_v26  ;;  %v3262_v26 = vld [vmem:[#allocation6 + $0x10] sm:$0xff] }
 0xf37   :  { %v1632_v17 = vpop.permute.xlu0 %1631 }
 0xf38   :  { %v1634_v19 = vmul.f32 %v3206_v16, %v1632_v17 }
 0xf3a   :  { %1636 = vrot.lane.b32.xlu0 %v1634_v19, %s3466_s20 }
 0xf3c   :  { %v1738_v21 = vpop.permute.xlu1 %1737 }
 0xf3d   :  { %v1740_v22 = vmul.f32 %v3208_v20, %v1738_v21  ;;  %v3257_v21 = vld [vmem:[#allocation8 + $0x18] sm:$0xff] }
 0xf3f   :  { %1742 = vrot.lane.b32.xlu1 %v1740_v22, %s3466_s20  ;;  %v3258_v22 = vld [vmem:[#allocation8 + $0x10] sm:$0xff] }
 0xfac   :  { %v1637_v24 = vpop.permute.xlu0 %1636 }
 0xfad   :  { %v3930_v25 = vadd.f32 %v1637_v24, %v1629_v23  ;;  %v3259_v23 = vld [vmem:[#allocation8 + $0x8] sm:$0xff]  ;;  %v3260_v24 = vld [vmem:[#allocation8] sm:$0xff] }
 0xfaf   :  { %3209 = vtanh.f32 %v3930_v25 }
 0xfb1   :  { %v1743_v28 = vpop.permute.xlu1 %1742 }
 0xfb2   :  { %v3934_v29 = vadd.f32 %v1743_v28, %v1735_v27  ;;  %v3263_v27 = vld [vmem:[#allocation6 + $0x8] sm:$0xff]  ;;  %v3264_v28 = vld [vmem:[#allocation6] sm:$0xff] }
 0xfb4   :  { %3211 = vtanh.f32 %v3934_v29  ;;  %v2012_v62 = vrot.slane %v3934_v29, 6 }
 0xfbc   :  { %v3210_v30 = vpop.eup %3209 }
 0xfbd   :  { %1642 = vrot.lane.b32.xlu0 %v3210_v30, %s3471_s19 }
 0xfc1   :  { %v3212_v31 = vpop.eup %3211 }
 0xfc2   :  { %1748 = vrot.lane.b32.xlu1 %v3212_v31, %s3471_s19 }
0x102f   :  { %v1643_v39 = vpop.permute.xlu0 %1642 }
0x1030   :  { %v1645_v41 = vmul.f32 %v3206_v16, %v1643_v39 }
0x1032   :  { %1647 = vrot.lane.b32.xlu0 %v1645_v41, %s3466_s20 }
0x1034   :  { %v1749_v42 = vpop.permute.xlu1 %1748 }
0x1035   :  { %v1751_v43 = vmul.f32 %v3208_v20, %v1749_v42  ;;  %v3265_v42 = vld [vmem:[#allocation9] ss:$0 sm:$0xff] }
0x1037   :  { %v1825_v44 = vrot.slane %v1751_v43, 2 }
0x1039   :  { %1826 = vrot.lane.b32.xlu1 %v1825_v44, %s3466_s20 }
0x10a4   :  { %v1648_v45 = vpop.permute.xlu0 %1647 }
0x10a5   :  { %1650 = vst.msk [vmem:[#allocation2 + $0x8] sm:$0x3] %vm537_vm2, %v1648_v45  ;;  %3018 = vmatmul.mubr.msk.f32.vlgmr.msra.gmra.mxu1 %vm160_vm1, %v1648_v45 }
0x10a6   :  { %3032 = vmatpush3.msra.mxu1 %v3943_v46  ;;  %3039 = vmatprep.mubr.msk.f32.mxu1 %vm3470_vm0, %v3469_v0 }
0x10a7   :  { %3033 = vmatprep.subr.mxu1 %v3469_v0 }
0x10a8   :  { %3034 = vmatpush3.msra.mxu1 %v3949_v48 }
0x10a9   :  { %3035 = vmatprep.subr.mxu1 %v3469_v0 }
0x10aa   :  { %3036 = vmatpush3.msra.mxu1 %v3953_v49 }
0x10ab   :  { %v1827_v50 = vpop.permute.xlu1 %1826  ;;  %3037 = vmatprep.subr.mxu1 %v3469_v0 }
0x10ac   :  { %3029 = vmatmul.mubr.msk.f32.vlgmr.msra.gmra.mxu0 %vm160_vm1, %v1827_v50  ;;  %3038 = vmatpush3.msra.mxu1 %v3958_v18 }
0x10ad   :  { %3040 = vmatmul.mubr.msk.f32.vlgmr.msra.gmra.mxu1 %vm160_vm1, %v1827_v50  ;;  %3043 = vmatpush3.msra.mxu0 %v3643_v32 }
0x10ae   :  { %3044 = vmatprep.subr.mxu0 %v3469_v0  ;;  %3053 = vmatprep.subr.mxu1 %v3469_v0 }
0x10af   :  { %3045 = vmatpush3.msra.mxu0 %v3645_v33  ;;  %3054 = vmatpush3.msra.mxu1 %v3648_v34 }
0x10b0   :  { %3046 = vmatprep.subr.mxu0 %v3469_v0  ;;  %3055 = vmatprep.subr.mxu1 %v3469_v0 }
0x10b1   :  { %3047 = vmatpush3.msra.mxu0 %v3651_v35  ;;  %3056 = vmatpush3.msra.mxu1 %v3654_v36 }
0x10b2   :  { %3048 = vmatprep.subr.mxu0 %v3469_v0  ;;  %3050 = vmatprep.mubr.msk.f32.mxu0 %vm3470_vm0, %v3469_v0 }
0x10b3   :  { %3049 = vmatpush3.msra.mxu0 %v3661_v38  ;;  %3057 = vmatprep.subr.mxu1 %v3469_v0 }
0x10b4   :  { %3064 = vmatprep.subr.mxu0 %v3469_v0  ;;  %3058 = vmatpush3.msra.mxu1 %v3658_v37 }
0x10b5   :  { %3059 = vmatprep.subr.mxu1 %v3469_v0  ;;  %3061 = vmatprep.mubr.msk.f32.mxu1 %vm3470_vm0, %v3469_v0 }
0x10b6   :  { %3060 = vmatpush3.msra.mxu1 %v3668_v40 }
0x10b7   :  { %3075 = vmatprep.subr.mxu1 %v3469_v0 }
0x1165   :  { %v1820_v32 = vpop.f32.mrf.mxu1 }
0x1167   :  { %v3019_v33 = vpop.f32.mrf.mxu1 }
0x116c   :  { %v1896_v34 = vpop.f32.mrf.mxu0 }
0x116d   :  { %v1897_v35 = vadd.f32 %v1896_v34, %v1820_v32  ;;  %v1996_v36 = vpop.f32.mrf.mxu1 }
0x116e   :  { %v2001_v38 = vrot.slane %v1996_v36, 4  ;;  %v3030_v51 = vpop.f32.mrf.mxu0 }
0x116f   :  { %v1900_v52 = vadd.f32 %v3710_v47, %v1897_v35  ;;  %v3041_v53 = vpop.f32.mrf.mxu1 }
0x1170   :  { %v2003_v37 = vadd.f32 %v2001_v38, %v3629_v15 }
0x1171   :  { %3213 = vtanh.f32 %v1900_v52  ;;  %v2676_v40 = vmul.f32 -1.442695, %v1900_v52 }
0x1172   :  { %3215 = vtanh.f32 %v2003_v37  ;;  %v2678_v56 = vmul.f32 -1.442695, %v2003_v37 }
0x1173   :  { %3217 = vpow2.f32 %v2676_v40 }
0x1174   :  { %3219 = vpow2.f32 %v2678_v56 }
0x117e   :  { %v3214_v54 = vpop.eup %3213 }
0x117f   :  { %v3216_v55 = vpop.eup %3215  ;;  %1910 = vrot.lane.b32.xlu0 %v3214_v54, %s3471_s19 }
0x1180   :  { %2016 = vrot.lane.b32.xlu1 %v3216_v55, %s3471_s19  ;;  %v3218_v57 = vpop.eup %3217 }
0x1181   :  { %v3220_v58 = vpop.eup %3219  ;;  %v1904_v59 = vadd.f32 1.0, %v3218_v57 }
0x1182   :  { %v2007_v3 = vadd.f32 1.0, %v3220_v58 }
0x1183   :  { %3221 = vrcp.f32 %v1904_v59 }
0x1184   :  { %3223 = vrcp.f32 %v2007_v3 }
0x1190   :  { %v3222_v47 = vpop.eup %3221 }
0x1191   :  { %v3224_v7 = vpop.eup %3223  ;;  %v1908_v63 = vmul.f32 %v3222_v47, %v3930_v25  ;;  %v3261_v25 = vld [vmem:[#allocation6 + $0x18] sm:$0xff] }
0x1192   :  { %v2014_v2 = vmul.f32 %v3224_v7, %v2012_v62  ;;  %v2506_v62 = vld [vmem:[#allocation2] sm:$0xff] }
0x11f1   :  { %v1911_v4 = vpop.permute.xlu0 %1910 }
0x11f2   :  { %v1913_v9 = vmul.f32 %v3222_v47, %v1911_v4  ;;  %v2017_v60 = vpop.permute.xlu1 %2016 }
0x11f3   :  { %v2019_v61 = vmul.f32 %v3224_v7, %v2017_v60 }
0x11f4   :  { %1915 = vrot.lane.b32.xlu0 %v1913_v9, %s3466_s20 }
0x11f5   :  { %2021 = vrot.lane.b32.xlu1 %v2019_v61, %s3466_s20 }
0x1266   :  { %v1916_v1 = vpop.permute.xlu0 %1915 }
0x1267   :  { %v3991_v5 = vadd.f32 %v1916_v1, %v1908_v63  ;;  %v2022_v6 = vpop.permute.xlu1 %2021 }
0x1268   :  { %v3993_v8 = vadd.f32 %v2022_v6, %v2014_v2 }
0x1269   :  { %3225 = vtanh.f32 %v3991_v5 }
0x126a   :  { %3227 = vtanh.f32 %v3993_v8  ;;  %v2291_v40 = vrot.slane %v3993_v8, 6 }
0x1276   :  { %v3226_v10 = vpop.eup %3225 }
0x1277   :  { %v3228_v11 = vpop.eup %3227  ;;  %1921 = vrot.lane.b32.xlu0 %v3226_v10, %s3471_s19 }
0x1278   :  { %2027 = vrot.lane.b32.xlu1 %v3228_v11, %s3471_s19 }
0x12e9   :  { %v1922_v12 = vpop.permute.xlu0 %1921 }
0x12ea   :  { %v1924_v13 = vmul.f32 %v3222_v47, %v1922_v12  ;;  %v2028_v14 = vpop.permute.xlu1 %2027 }
0x12eb   :  { %v2030_v16 = vmul.f32 %v3224_v7, %v2028_v14 }
0x12ec   :  { %1926 = vrot.lane.b32.xlu0 %v1924_v13, %s3466_s20 }
0x12ed   :  { %v2104_v17 = vrot.slane %v2030_v16, 4 }
0x12ef   :  { %2105 = vrot.lane.b32.xlu1 %v2104_v17, %s3466_s20 }
0x135e   :  { %v1927_v19 = vpop.permute.xlu0 %1926 }
0x135f   :  { %1929 = vst.msk [vmem:[#allocation2 + $0xa] sm:$0x3] %vm537_vm2, %v1927_v19  ;;  %3051 = vmatmul.mubr.msk.f32.vlgmr.msra.gmra.mxu0 %vm160_vm1, %v1927_v19 }
0x1360   :  { %3065 = vmatpush3.msra.mxu0 %v3943_v46  ;;  %3072 = vmatprep.mubr.msk.f32.mxu0 %vm3470_vm0, %v3469_v0 }
0x1361   :  { %3066 = vmatprep.subr.mxu0 %v3469_v0  ;;  %v2106_v20 = vpop.permute.xlu1 %2105 }
0x1362   :  { %3067 = vmatpush3.msra.mxu0 %v3949_v48  ;;  %3062 = vmatmul.mubr.msk.f32.vlgmr.msra.gmra.mxu1 %vm160_vm1, %v2106_v20 }
0x1363   :  { %3068 = vmatprep.subr.mxu0 %v3469_v0  ;;  %3076 = vmatpush3.msra.mxu1 %v3257_v21 }
0x1364   :  { %3069 = vmatpush3.msra.mxu0 %v3953_v49  ;;  %3077 = vmatprep.subr.mxu1 %v3469_v0 }
0x1365   :  { %3070 = vmatprep.subr.mxu0 %v3469_v0  ;;  %3078 = vmatpush3.msra.mxu1 %v3258_v22 }
0x1366   :  { %3071 = vmatpush3.msra.mxu0 %v3958_v18  ;;  %3079 = vmatprep.subr.mxu1 %v3469_v0 }
0x1367   :  { %3073 = vmatmul.mubr.msk.f32.vlgmr.msra.gmra.mxu0 %vm160_vm1, %v2106_v20  ;;  %3080 = vmatpush3.msra.mxu1 %v3259_v23 }
0x1368   :  { %3081 = vmatprep.subr.mxu1 %v3469_v0  ;;  %3086 = vmatprep.subr.mxu0 %v3469_v0 }
0x1369   :  { %3082 = vmatpush3.msra.mxu1 %v3260_v24  ;;  %3083 = vmatprep.mubr.msk.f32.mxu1 %vm3470_vm0, %v3469_v0  ;;  %v2511_v24 = vld [vmem:[#allocation12 + $0x18] sm:$0xff] }
0x136a   :  { %3087 = vmatpush3.msra.mxu0 %v3261_v25  ;;  %3094 = vmatprep.mubr.msk.f32.mxu0 %vm3470_vm0, %v3469_v0  ;;  %v2510_v25 = vld [vmem:[#allocation12 + $0x10] sm:$0xff] }
0x136b   :  { %3088 = vmatprep.subr.mxu0 %v3469_v0  ;;  %3097 = vmatprep.subr.mxu1 %v2511_v24 }
0x136c   :  { %3089 = vmatpush3.msra.mxu0 %v3262_v26  ;;  %v2509_v26 = vld [vmem:[#allocation12 + $0x8] sm:$0xff] }
0x136d   :  { %3090 = vmatprep.subr.mxu0 %v3469_v0 }
0x136e   :  { %3091 = vmatpush3.msra.mxu0 %v3263_v27  ;;  %v2508_v27 = vld [vmem:[#allocation12] sm:$0xff] }
0x136f   :  { %3092 = vmatprep.subr.mxu0 %v3469_v0 }
0x1370   :  { %3093 = vmatpush3.msra.mxu0 %v3264_v28 }
0x141f   :  { %v2099_v29 = vpop.f32.mrf.mxu0 }
0x1421   :  { %v3052_v30 = vpop.f32.mrf.mxu0 }
0x1422   :  { %v2175_v31 = vpop.f32.mrf.mxu1 }
0x1423   :  { %v2176_v39 = vadd.f32 %v2175_v31, %v2099_v29 }
0x1424   :  { %v3063_v41 = vpop.f32.mrf.mxu1 }
0x1425   :  { %v2179_v43 = vadd.f32 %v3265_v42, %v2176_v39 }
0x1427   :  { %3229 = vtanh.f32 %v2179_v43  ;;  %v2275_v44 = vpop.f32.mrf.mxu0  ;;  %v2681_v50 = vmul.f32 -1.442695, %v2179_v43 }
0x1428   :  { %v2280_v45 = vrot.slane %v2275_v44, 2 }
0x1429   :  { %v3074_v46 = vpop.f32.mrf.mxu0 }
0x142a   :  { %v2282_v48 = vadd.f32 %v2280_v45, %v3629_v15 }
0x142c   :  { %3231 = vtanh.f32 %v2282_v48  ;;  %v2683_v18 = vmul.f32 -1.442695, %v2282_v48 }
0x142d   :  { %3233 = vpow2.f32 %v2681_v50 }
0x142e   :  { %3235 = vpow2.f32 %v2683_v18 }
0x1434   :  { %v3230_v49 = vpop.eup %3229 }
0x1435   :  { %2189 = vrot.lane.b32.xlu1 %v3230_v49, %s3471_s19 }
0x1439   :  { %v3232_v0 = vpop.eup %3231 }
0x143a   :  { %2295 = vrot.lane.b32.xlu0 %v3232_v0, %s3471_s19  ;;  %v3234_v32 = vpop.eup %3233 }
0x143b   :  { %v2183_v33 = vadd.f32 1.0, %v3234_v32  ;;  %v3236_v34 = vpop.eup %3235 }
0x143c   :  { %v2286_v35 = vadd.f32 1.0, %v3236_v34 }
0x143d   :  { %3237 = vrcp.f32 %v2183_v33 }
0x143e   :  { %3239 = vrcp.f32 %v2286_v35 }
0x144a   :  { %v3238_v36 = vpop.eup %3237 }
0x144b   :  { %v3240_v51 = vpop.eup %3239  ;;  %v2187_v37 = vmul.f32 %v3238_v36, %v3991_v5 }
0x144c   :  { %v2293_v56 = vmul.f32 %v3240_v51, %v2291_v40 }
0x14a7   :  { %v2190_v38 = vpop.permute.xlu1 %2189 }
0x14a8   :  { %v2192_v15 = vmul.f32 %v3238_v36, %v2190_v38 }
0x14aa   :  { %2194 = vrot.lane.b32.xlu1 %v2192_v15, %s3466_s20 }
0x14ac   :  { %v2296_v52 = vpop.permute.xlu0 %2295 }
0x14ad   :  { %v2298_v53 = vmul.f32 %v3240_v51, %v2296_v52 }
0x14af   :  { %2300 = vrot.lane.b32.xlu0 %v2298_v53, %s3466_s20 }
0x151c   :  { %v2195_v54 = vpop.permute.xlu1 %2194 }
0x151d   :  { %v2197_v55 = vadd.f32 %v2195_v54, %v2187_v37 }
0x151f   :  { %3241 = vtanh.f32 %v2197_v55 }
0x1521   :  { %v2301_v57 = vpop.permute.xlu0 %2300 }
0x1522   :  { %v4032_v58 = vadd.f32 %v2301_v57, %v2293_v56 }
0x1524   :  { %3243 = vtanh.f32 %v4032_v58 }
0x152c   :  { %v3242_v59 = vpop.eup %3241 }
0x152d   :  { %2200 = vrot.lane.b32.xlu1 %v3242_v59, %s3471_s19 }
0x1531   :  { %v3244_v3 = vpop.eup %3243 }
0x1532   :  { %2306 = vrot.lane.b32.xlu0 %v3244_v3, %s3471_s19 }
0x159f   :  { %v2201_v47 = vpop.permute.xlu1 %2200 }
0x15a0   :  { %v2203_v4 = vmul.f32 %v3238_v36, %v2201_v47 }
0x15a2   :  { %2205 = vrot.lane.b32.xlu0 %v2203_v4, %s3466_s20 }
0x15a4   :  { %v2307_v7 = vpop.permute.xlu0 %2306 }
0x15a5   :  { %v2309_v9 = vmul.f32 %v3240_v51, %v2307_v7 }
0x15a7   :  { %v2383_v60 = vrot.slane %v2309_v9, 6 }
0x15a9   :  { %2384 = vrot.lane.b32.xlu1 %v2383_v60, %s3466_s20 }
0x1614   :  { %v2206_v61 = vpop.permute.xlu0 %2205 }
0x1615   :  { %2208 = vst.msk [vmem:[#allocation2 + $0xc] sm:$0x3] %vm537_vm2, %v2206_v61  ;;  %3084 = vmatmul.mubr.msk.f32.vlgmr.msra.gmra.mxu1 %vm160_vm1, %v2206_v61 }
0x1616   :  { %3105 = vmatprep.mubr.msk.f32.mxu1 %vm160_vm1, %v2506_v62  ;;  %3098 = vmatpush3.msra.mxu1 %v2511_v24 }
0x1617   :  { %3099 = vmatprep.subr.mxu1 %v2510_v25 }
0x1618   :  { %3100 = vmatpush3.msra.mxu1 %v2510_v25 }
0x1619   :  { %3101 = vmatprep.subr.mxu1 %v2509_v26 }
0x161a   :  { %3102 = vmatpush3.msra.mxu1 %v2509_v26 }
0x161b   :  { %v2385_v63 = vpop.permute.xlu1 %2384  ;;  %3103 = vmatprep.subr.mxu1 %v2508_v27 }
0x161c   :  { %3095 = vmatmul.mubr.msk.f32.vlgmr.msra.gmra.mxu0 %vm160_vm1, %v2385_v63  ;;  %3104 = vmatpush3.msra.mxu1 %v2508_v27 }
0x16d5   :  { %v2378_v1 = vpop.f32.mrf.mxu1 }
0x16d7   :  { %v3085_v2 = vpop.f32.mrf.mxu1 }
0x16dc   :  { %v2454_v5 = vpop.f32.mrf.mxu0 }
0x16dd   :  { %v2455_v6 = vadd.f32 %v2454_v5, %v2378_v1 }
0x16de   :  { %v3096_v8 = vpop.f32.mrf.mxu0 }
0x16df   :  { %v2458_v10 = vadd.f32 %v3265_v42, %v2455_v6 }
0x16e1   :  { %3245 = vtanh.f32 %v2458_v10  ;;  %v2686_v12 = vmul.f32 -1.442695, %v2458_v10 }
0x16e3   :  { %3247 = vpow2.f32 %v2686_v12 }
0x16ee   :  { %v3246_v11 = vpop.eup %3245 }
0x16ef   :  { %2468 = vrot.lane.b32.xlu0 %v3246_v11, %s3471_s19 }
0x16f0   :  { %v3248_v13 = vpop.eup %3247 }
0x16f1   :  { %v2462_v14 = vadd.f32 1.0, %v3248_v13 }
0x16f3   :  { %3249 = vrcp.f32 %v2462_v14 }
0x1700   :  { %v3250_v16 = vpop.eup %3249 }
0x1701   :  { %v2466_v20 = vmul.f32 %v3250_v16, %v2197_v55 }
0x1761   :  { %v2469_v17 = vpop.permute.xlu0 %2468 }
0x1762   :  { %v2471_v19 = vmul.f32 %v3250_v16, %v2469_v17 }
0x1764   :  { %2473 = vrot.lane.b32.xlu1 %v2471_v19, %s3466_s20 }
0x17d6   :  { %v2474_v21 = vpop.permute.xlu1 %2473 }
0x17d7   :  { %v2476_v22 = vadd.f32 %v2474_v21, %v2466_v20 }
0x17d9   :  { %3251 = vtanh.f32 %v2476_v22 }
0x17e6   :  { %v3252_v23 = vpop.eup %3251 }
0x17e7   :  { %2479 = vrot.lane.b32.xlu0 %v3252_v23, %s3471_s19 }
0x17eb   :  { %2488 = vrot.lane.b32.xlu0 %v2309_v9, %s3466_s20 }
0x17ef   :  { %2501 = vrot.lane.b32.xlu0 %v2476_v22, %s3472_s8 }
0x1859   :  { %v2480_v28 = vpop.permute.xlu0 %2479 }
0x185a   :  { %v2482_v29 = vmul.f32 %v3250_v16, %v2480_v28 }
0x185c   :  { %2484 = vrot.lane.b32.xlu1 %v2482_v29, %s3466_s20 }
0x185d   :  { %v2489_v30 = vpop.permute.xlu0 %2488 }
0x185e   :  { %2492 = vst.msk [vmem:[#allocation15 - $0x6] sm:$0xc0] %vm2491_vm3, %v2489_v30 }
0x1860   :  { %2494 = vrot.lane.b32.xlu1 %v4032_v58, %s3472_s8 }
0x1861   :  { %v2502_v31 = vpop.permute.xlu0 %2501 }
0x1862   :  { %2505 = vst.msk [vmem:[#allocation16 + $0x2] sm:$0x3] %vm537_vm2, %v2502_v31 }
0x18ce   :  { %v2485_v39 = vpop.permute.xlu1 %2484 }
0x18cf   :  { %2487 = vst.msk [vmem:[#allocation2 + $0xe] sm:$0x3] %vm537_vm2, %v2485_v39  ;;  %2499 = vst.msk [vmem:[#allocation15 + $0x2] sm:$0x3] %vm537_vm2, %v2485_v39 }
0x18d2   :  { %v2495_v41 = vpop.permute.xlu1 %2494 }
0x18d3   :  { %2497 = vst.msk [vmem:[#allocation16 - $0x6] sm:$0xc0] %vm2491_vm3, %v2495_v41 }
0x18d6   :  { %v2507_v42 = vld [vmem:[#allocation2 + $0x8] sm:$0xff] }
0x18d7   :  { %3106 = vmatmul.mubr.msk.f32.vlgmr.msra.gmra.mxu1 %vm160_vm1, %v2507_v42 }
0x18d8   :  { %3417 = shalt.err (!%p3414_p11)
}
0x18d9   :  { %2615 = dma.vmem_to_hbm [thread:$0]  %s2610_s25, 64, %s4083_s12, [#allocation5], %s3466_s20, %s3466_s20, %s3467_s21  }
0x18da   :  { %s3426_s26 = scalar_lea.vmem %s2622_s30, 64  ;;  %p3431_p13 = scmp.lt.s32.totalorder %s2622_s30, %s2622_s30 }
0x18db   :  { %p3427_p12 = scmp.ne.s32.totalorder %s2622_s30, %s3426_s26  ;;  %p3432_p0 = scmp.lt.s32.totalorder %s3426_s26, %s3426_s26 }
0x18dd   :  { %p3433_p1 = por %p3432_p0, %p3431_p13 }
0x18df   :  { %p3434_p2 = pnand %p3433_p1, %p3427_p12 }
0x18e1   :  { %3437 = shalt.err (!%p3434_p2)
}
0x18e2   :  { %2627 = dma.vmem_to_hbm [thread:$0]  %s2622_s30, 64, %s4084_s13, [#allocation17], %s3466_s20, %s3466_s20, %s3467_s21   ;;  %v2687_v43 = vld [vmem:[#allocation14] ss:$0 sm:$0xff] }
0x1997   :  { %v3107_v44 = vpop.f32.mrf.mxu1 }
0x1998   :  { %v2597_v45 = vadd.f32 %v3107_v44, %v2687_v43 }
0x1999   :  { %v2591_v46 = vpop.f32.mrf.mxu1 }
0x199a   :  { %2601 = vst [vmem:[%s4082_s11 + $0x8] sm:$0xff] %v2597_v45  ;;  %v2592_v48 = vadd.f32 %v2687_v43, %v2591_v46 }
0x199c   :  { %2600 = vst [vmem:[%s4082_s11] sm:$0xff] %v2592_v48 }
0x199d   :  { %3454 = dma.done.wait [#allocation5], 64  }
0x199e   :  { %3455 = vsyncadd [#allocation5], 4294967232 }
0x199f   :  { %3456 = dma.done.wait [#allocation17], 64  }
0x19a0   :  { %3457 = vsyncadd [#allocation17], 4294967232 }
0x19a1   :  { %2636 = vsyncpa [#allocation4], 1 }
0x19a2   :  { %2637 = vsyncpa [#allocation7], 1 }
0x19a3   :  { %2638 = vsyncpa [#allocation10], 1 }
0x19a4   :  { %2639 = vsyncpa [#allocation13], 1 }
0x19a5   :  { %2640 = vsyncpa [#allocation5], 1 }
0x19a6   :  { %2641 = vsyncpa [#allocation17], 1 }

</bundles_post_ra>
